<compile_context>
chip_gen: v5e
topology: v5e:2x2
jax: 0.10.0
libtpu: 0.0.40
codegen_flags: <defaults>
</compile_context>

<pallas_src>
import jax
import jax.numpy as jnp
from jax.experimental import pallas as pl
from jax.experimental.pallas import tpu as pltpu


def _lstm_net_kernel(x_ref,      # (T*BP, I)   bf16, time-major rows (t major, b minor)
                     wih1_ref,   # (I, 4H)     bf16, gate order [i, f, o, g]
                     b1_ref,     # (1, 4H)     f32  (= b_ih + b_hh, layer 0), permuted
                     w1x2_ref,   # (H, 8H)     bf16 = [whh1 | wih2], permuted
                     whh2_ref,   # (H, 4H)     bf16, permuted
                     b2_ref,     # (1, 4H)     f32  (= b_ih + b_hh, layer 1), permuted
                     fc1w_ref,   # (H, H//2)   bf16
                     fc1b_ref,   # (1, H//2)   f32
                     fc2w_ref,   # (H//2, OP)  bf16, O zero-padded to OP (>=128 lanes)
                     fc2b_ref,   # (1, OP)     f32
                     out_ref):   # (BP, OP)    f32
    TB = x_ref.shape[0]
    BP = out_ref.shape[0]
    T = TB // BP
    H = whh2_ref.shape[0]
    G = 4 * H

    w1x2 = w1x2_ref[...]          # (H, 8H) bf16
    whh2 = whh2_ref[...]          # (H, 4H) bf16
    # Pre-broadcast bias once (JAX does not CSE broadcast_in_dim inside the loop).
    b2 = jnp.broadcast_to(b2_ref[...], (BP, G))

    # Hoisted layer-1 input projection: ONE matmul for all timesteps, bias
    # folded in, reshaped (T, BP, 4H) so each unrolled step indexes a
    # tile-aligned slab instead of a non-8-aligned sublane window.
    xw1 = (jnp.dot(x_ref[...], wih1_ref[...], preferred_element_type=jnp.float32)
           + b1_ref[...]).reshape(T, BP, G)

    def activate(gates, c):
        # gate layout [i, f, o, g]: one contiguous sigmoid over 3H lanes.
        sig = jax.nn.sigmoid(gates[:, :3 * H])
        i_g = sig[:, 0 * H:1 * H]
        f_g = sig[:, 1 * H:2 * H]
        o_g = sig[:, 2 * H:3 * H]
        g_g = jnp.tanh(gates[:, 3 * H:4 * H])
        c_new = f_g * c + i_g * g_g
        h_new = o_g * jnp.tanh(c_new)
        return h_new, c_new

    c1 = c2 = jnp.zeros((BP, H), jnp.float32)
    h2 = jnp.zeros((BP, H), jnp.float32)
    # Carried recurrent products (initial h1 = h2 = 0 => zero products).
    h1w = jnp.zeros((BP, 2 * G), jnp.float32)   # [h1 @ whh1 | h1 @ wih2]
    h2w = jnp.zeros((BP, G), jnp.float32)       # h2 @ whh2

    # T is small and static: full unroll => static slices + scheduler visibility.
    for t in range(T):
        # ---- layer-1 chain ----
        gates1 = xw1[t] + h1w[:, :G]
        h1, c1 = activate(gates1, c1)
        # Dense fused matmul issued right after act1: wih2 half used by
        # layer-2 now, whh1 half used by layer-1 at t+1.
        h1w = jnp.dot(h1.astype(jnp.bfloat16), w1x2,
                      preferred_element_type=jnp.float32)        # (BP, 8H)
        # ---- layer-2 chain (overlaps with the next layer-1 matmul) ----
        gates2 = h1w[:, G:] + h2w + b2
        h2, c2 = activate(gates2, c2)
        if t + 1 < T:   # last step's product is never consumed
            h2w = jnp.dot(h2.astype(jnp.bfloat16), whh2,
                          preferred_element_type=jnp.float32)    # (BP, 4H)

    # dropout == identity (inference); fc1 -> ReLU -> fc2 (lane-padded output).
    hid = (jnp.dot(h2.astype(jnp.bfloat16), fc1w_ref[...],
                   preferred_element_type=jnp.float32) + fc1b_ref[...])
    hid = jnp.maximum(hid, 0.0)
    out_ref[...] = (jnp.dot(hid.astype(jnp.bfloat16), fc2w_ref[...],
                            preferred_element_type=jnp.float32) + fc2b_ref[...])


def _permute_gates(w, H):
    """Reorder the 4H gate axis (last axis) from PyTorch [i,f,g,o] to [i,f,o,g]."""
    return jnp.concatenate(
        [w[..., 0 * H:1 * H], w[..., 1 * H:2 * H],
         w[..., 3 * H:4 * H], w[..., 2 * H:3 * H]], axis=-1)


def _prepare_weights(params):
    """Wrapper-time packing: gate permutation, fused [whh1|wih2], bf16 matmul
    operands, lane-padded fc2."""
    H = params["whh1"].shape[0]
    O = params["fc2_w"].shape[1]
    OP = max(128, ((O + 127) // 128) * 128)

    wih1 = _permute_gates(params["wih1"], H).astype(jnp.bfloat16)
    whh1 = _permute_gates(params["whh1"], H)
    b1 = _permute_gates(params["b1"], H).astype(jnp.float32)
    wih2 = _permute_gates(params["wih2"], H)
    whh2 = _permute_gates(params["whh2"], H).astype(jnp.bfloat16)
    b2 = _permute_gates(params["b2"], H).astype(jnp.float32)

    # Dense fused layer-1 output weight (no zero padding; both halves used):
    #   h1 @ [whh1 | wih2] = [h1 @ whh1 | h1 @ wih2]
    w1x2 = jnp.concatenate([whh1, wih2], axis=1).astype(jnp.bfloat16)   # (H, 8H)

    fc1w = params["fc1_w"].astype(jnp.bfloat16)
    fc1b = params["fc1_b"].astype(jnp.float32)
    fc2w = (jnp.zeros((H // 2, OP), jnp.float32)
            .at[:, :O].set(params["fc2_w"]).astype(jnp.bfloat16))
    fc2b = jnp.zeros((1, OP), jnp.float32).at[:, :O].set(params["fc2_b"])

    return dict(wih1=wih1, b1=b1, w1x2=w1x2, whh2=whh2, b2=b2,
                fc1_w=fc1w, fc1_b=fc1b, fc2_w=fc2w, fc2_b=fc2b,
                OP=OP, O=O, H=H)


def lstm_net_forward(x, params):
    """x: (B, T, I) float32.  Returns (B, output_size) float32."""
    B, T, I = x.shape
    prep = _prepare_weights(params)
    H, O, OP = prep["H"], prep["O"], prep["OP"]
    BP = max(8, ((B + 7) // 8) * 8)     # sublane-align the batch

    # Time-major, batch zero-padded, flattened to (T*BP, I); bf16 MXU operand.
    x_tm = jnp.transpose(x, (1, 0, 2)).astype(jnp.float32)      # (T, B, I)
    x_tm = jnp.pad(x_tm, ((0, 0), (0, BP - B), (0, 0)))
    x_2d = x_tm.reshape(T * BP, I).astype(jnp.bfloat16)

    # Advisory cost hint so XLA schedules the surrounding prep ops sensibly.
    flops = (2 * T * BP * I * 4 * H            # hoisted layer-1 input projection
             + 2 * T * BP * H * 8 * H          # per-step h1 @ [whh1|wih2]
             + 2 * (T - 1) * BP * H * 4 * H    # per-step h2 @ whh2
             + 2 * BP * H * (H // 2)           # fc1
             + 2 * BP * (H // 2) * OP)         # fc2 (padded)
    transcendentals = T * BP * 2 * 5 * H       # 3 sigmoid + 2 tanh blocks / layer / step
    operands = (x_2d, prep["wih1"], prep["b1"], prep["w1x2"], prep["whh2"],
                prep["b2"], prep["fc1_w"], prep["fc1_b"], prep["fc2_w"], prep["fc2_b"])
    bytes_accessed = int(sum(a.size * a.dtype.itemsize for a in operands)
                         + BP * OP * 4                       # output
                         + T * BP * 4 * H * 4)               # resident xw1 intermediate
    vmem_limit = int(min(64 * 1024 * 1024,
                         max(4 * 1024 * 1024, 4 * bytes_accessed)))

    vmem = pl.BlockSpec(memory_space=pltpu.MemorySpace.VMEM)
    out_padded = pl.pallas_call(
        _lstm_net_kernel,
        out_shape=jax.ShapeDtypeStruct((BP, OP), jnp.float32),
        in_specs=[vmem] * 10,
        out_specs=vmem,
        compiler_params=pltpu.CompilerParams(vmem_limit_bytes=vmem_limit),
        cost_estimate=pl.CostEstimate(flops=flops,
                                      transcendentals=transcendentals,
                                      bytes_accessed=bytes_accessed),
    )(*operands)

    return out_padded[:B, :O]


def init_params(key, input_size, hidden_size, output_size):
    """Deterministic init mimicking PyTorch's uniform(-1/sqrt(H), 1/sqrt(H)).
    Stored in PyTorch gate order [i, f, g, o]; the wrapper permutes/packs."""
    H = hidden_size
    k = 1.0 / jnp.sqrt(jnp.float32(H))
    keys = jax.random.split(key, 12)

    def u(kk, shape):
        return jax.random.uniform(kk, shape, jnp.float32, -k, k)

    return dict(
        wih1=u(keys[0], (input_size, 4 * H)),
        whh1=u(keys[1], (H, 4 * H)),
        b1=u(keys[2], (1, 4 * H)) + u(keys[3], (1, 4 * H)),   # b_ih + b_hh
        wih2=u(keys[4], (H, 4 * H)),
        whh2=u(keys[5], (H, 4 * H)),
        b2=u(keys[6], (1, 4 * H)) + u(keys[7], (1, 4 * H)),
        fc1_w=u(keys[8], (H, H // 2)),
        fc1_b=u(keys[9], (1, H // 2)),
        fc2_w=u(keys[10], (H // 2, output_size)),
        fc2_b=u(keys[11], (1, output_size)),
    )


def reference_forward(x, params):
    """Pure-JAX f32 reference in original PyTorch gate order (validates the
    wrapper's gate permutation / fused-weight packing / batch+lane padding)."""
    B, T, I = x.shape
    H = params["whh1"].shape[0]

    def cell(x_t, h, c, wih, whh, b):
        g = x_t @ wih + h @ whh + b
        i = jax.nn.sigmoid(g[:, 0 * H:1 * H])
        f = jax.nn.sigmoid(g[:, 1 * H:2 * H])
        gg = jnp.tanh(g[:, 2 * H:3 * H])
        o = jax.nn.sigmoid(g[:, 3 * H:4 * H])
        c = f * c + i * gg
        return o * jnp.tanh(c), c

    h1 = c1 = h2 = c2 = jnp.zeros((B, H), jnp.float32)
    for t in range(T):
        h1, c1 = cell(x[:, t, :], h1, c1, params["wih1"], params["whh1"], params["b1"])
        h2, c2 = cell(h1, h2, c2, params["wih2"], params["whh2"], params["b2"])
    hid = jnp.maximum(h2 @ params["fc1_w"] + params["fc1_b"], 0.0)
    return hid @ params["fc2_w"] + params["fc2_b"]


if __name__ == "__main__":
    # Small, module-consistent shapes: batch=2, seq=8, input_size=4,
    # hidden_size=32, num_layers=2, output_size=1.
    B, T, I, H, O = 2, 8, 4, 32, 1

    key = jax.random.PRNGKey(0)
    kx, kp = jax.random.split(key)
    x = jax.random.normal(kx, (B, T, I), jnp.float32)
    params = init_params(kp, I, H, O)

    out = jax.block_until_ready(lstm_net_forward(x, params))
    ref = reference_forward(x, params)

    assert out.shape == (B, O)
    # bf16 MXU operands (f32 accumulation) vs. the pure-f32 reference; the
    # T-step recurrence compounds rounding, hence the looser tolerance.
    assert jnp.allclose(out, ref, atol=3e-2, rtol=3e-2), (out, ref)

    print("KERNEL_OK")
</pallas_src>

<mosaic_0001>
module attributes {stable_mosaic.version = 11 : i64} {
  func.func @_lstm_net_kernel(%arg0: memref<64x4xbf16, #tpu.memory_space<vmem>>, %arg1: memref<4x128xbf16, #tpu.memory_space<vmem>>, %arg2: memref<1x128xf32, #tpu.memory_space<vmem>>, %arg3: memref<32x256xbf16, #tpu.memory_space<vmem>>, %arg4: memref<32x128xbf16, #tpu.memory_space<vmem>>, %arg5: memref<1x128xf32, #tpu.memory_space<vmem>>, %arg6: memref<32x16xbf16, #tpu.memory_space<vmem>>, %arg7: memref<1x16xf32, #tpu.memory_space<vmem>>, %arg8: memref<16x128xbf16, #tpu.memory_space<vmem>>, %arg9: memref<1x128xf32, #tpu.memory_space<vmem>>, %arg10: memref<8x128xf32, #tpu.memory_space<vmem>>) attributes {dimension_semantics = [], scalar_prefetch = 0 : i64, scratch_operands = 0 : i64, tpu.core_type = #tpu.core_type<tc>} {
    %c0 = arith.constant 0 : index
    %c0_0 = arith.constant 0 : index
    %0 = vector.load %arg3[%c0, %c0_0] : memref<32x256xbf16, #tpu.memory_space<vmem>>, vector<32x256xbf16>
    %c0_1 = arith.constant 0 : index
    %c0_2 = arith.constant 0 : index
    %1 = vector.load %arg4[%c0_1, %c0_2] : memref<32x128xbf16, #tpu.memory_space<vmem>>, vector<32x128xbf16>
    %c0_3 = arith.constant 0 : index
    %c0_4 = arith.constant 0 : index
    %2 = vector.load %arg5[%c0_3, %c0_4] : memref<1x128xf32, #tpu.memory_space<vmem>>, vector<1x128xf32>
    %3 = vector.shape_cast %2 : vector<1x128xf32> to vector<1x128xf32>
    %4 = vector.broadcast %3 : vector<1x128xf32> to vector<8x128xf32>
    %c0_5 = arith.constant 0 : index
    %c0_6 = arith.constant 0 : index
    %5 = vector.load %arg0[%c0_5, %c0_6] : memref<64x4xbf16, #tpu.memory_space<vmem>>, vector<64x4xbf16>
    %c0_7 = arith.constant 0 : index
    %c0_8 = arith.constant 0 : index
    %6 = vector.load %arg1[%c0_7, %c0_8] : memref<4x128xbf16, #tpu.memory_space<vmem>>, vector<4x128xbf16>
    %cst = arith.constant dense<0.000000e+00> : vector<64x128xf32>
    %7 = tpu.matmul %5, %6, %cst {dimension_numbers = #tpu.dot_dimension_numbers<[1], [0], [0], [1], [0, 0, 1, 1], [], []>} : vector<64x4xbf16>, vector<4x128xbf16>, vector<64x128xf32> -> vector<64x128xf32>
    %c0_9 = arith.constant 0 : index
    %c0_10 = arith.constant 0 : index
    %8 = vector.load %arg2[%c0_9, %c0_10] : memref<1x128xf32, #tpu.memory_space<vmem>>, vector<1x128xf32>
    %9 = vector.broadcast %8 : vector<1x128xf32> to vector<64x128xf32>
    %10 = arith.addf %7, %9 : vector<64x128xf32>
    %11 = vector.shape_cast %10 : vector<64x128xf32> to vector<8x8x128xf32>
    %cst_11 = arith.constant 0.000000e+00 : f32
    %12 = vector.broadcast %cst_11 : f32 to vector<8x32xf32>
    %cst_12 = arith.constant 0.000000e+00 : f32
    %13 = vector.broadcast %cst_12 : f32 to vector<8x256xf32>
    %cst_13 = arith.constant 0.000000e+00 : f32
    %14 = vector.broadcast %cst_13 : f32 to vector<8x128xf32>
    %15 = vector.extract_strided_slice %11 {offsets = [0, 0, 0], sizes = [1, 8, 128], strides = [1, 1, 1]} : vector<8x8x128xf32> to vector<1x8x128xf32>
    %16 = vector.shape_cast %15 : vector<1x8x128xf32> to vector<8x128xf32>
    %17 = vector.extract_strided_slice %13 {offsets = [0, 0], sizes = [8, 128], strides = [1, 1]} : vector<8x256xf32> to vector<8x128xf32>
    %18 = arith.addf %16, %17 : vector<8x128xf32>
    %19 = vector.extract_strided_slice %18 {offsets = [0, 0], sizes = [8, 96], strides = [1, 1]} : vector<8x128xf32> to vector<8x96xf32>
    %20 = arith.negf %19 : vector<8x96xf32>
    %21 = math.exp %20 : vector<8x96xf32>
    %cst_14 = arith.constant 1.000000e+00 : f32
    %22 = vector.broadcast %cst_14 : f32 to vector<8x96xf32>
    %23 = arith.addf %22, %21 : vector<8x96xf32>
    %24 = arith.divf %22, %23 : vector<8x96xf32>
    %25 = vector.extract_strided_slice %24 {offsets = [0, 0], sizes = [8, 32], strides = [1, 1]} : vector<8x96xf32> to vector<8x32xf32>
    %26 = vector.extract_strided_slice %24 {offsets = [0, 32], sizes = [8, 32], strides = [1, 1]} : vector<8x96xf32> to vector<8x32xf32>
    %27 = vector.extract_strided_slice %24 {offsets = [0, 64], sizes = [8, 32], strides = [1, 1]} : vector<8x96xf32> to vector<8x32xf32>
    %28 = vector.extract_strided_slice %18 {offsets = [0, 96], sizes = [8, 32], strides = [1, 1]} : vector<8x128xf32> to vector<8x32xf32>
    %29 = math.tanh %28 : vector<8x32xf32>
    %30 = arith.mulf %26, %12 : vector<8x32xf32>
    %31 = arith.mulf %25, %29 : vector<8x32xf32>
    %32 = arith.addf %30, %31 : vector<8x32xf32>
    %33 = math.tanh %32 : vector<8x32xf32>
    %34 = arith.mulf %27, %33 : vector<8x32xf32>
    %35 = arith.truncf %34 : vector<8x32xf32> to vector<8x32xbf16>
    %cst_15 = arith.constant dense<0.000000e+00> : vector<8x256xf32>
    %36 = tpu.matmul %35, %0, %cst_15 {dimension_numbers = #tpu.dot_dimension_numbers<[1], [0], [0], [1], [0, 0, 1, 1], [], []>} : vector<8x32xbf16>, vector<32x256xbf16>, vector<8x256xf32> -> vector<8x256xf32>
    %37 = vector.extract_strided_slice %36 {offsets = [0, 128], sizes = [8, 128], strides = [1, 1]} : vector<8x256xf32> to vector<8x128xf32>
    %38 = arith.addf %37, %14 : vector<8x128xf32>
    %39 = arith.addf %38, %4 : vector<8x128xf32>
    %40 = vector.extract_strided_slice %39 {offsets = [0, 0], sizes = [8, 96], strides = [1, 1]} : vector<8x128xf32> to vector<8x96xf32>
    %41 = arith.negf %40 : vector<8x96xf32>
    %42 = math.exp %41 : vector<8x96xf32>
    %cst_16 = arith.constant 1.000000e+00 : f32
    %43 = vector.broadcast %cst_16 : f32 to vector<8x96xf32>
    %44 = arith.addf %43, %42 : vector<8x96xf32>
    %45 = arith.divf %43, %44 : vector<8x96xf32>
    %46 = vector.extract_strided_slice %45 {offsets = [0, 0], sizes = [8, 32], strides = [1, 1]} : vector<8x96xf32> to vector<8x32xf32>
    %47 = vector.extract_strided_slice %45 {offsets = [0, 32], sizes = [8, 32], strides = [1, 1]} : vector<8x96xf32> to vector<8x32xf32>
    %48 = vector.extract_strided_slice %45 {offsets = [0, 64], sizes = [8, 32], strides = [1, 1]} : vector<8x96xf32> to vector<8x32xf32>
    %49 = vector.extract_strided_slice %39 {offsets = [0, 96], sizes = [8, 32], strides = [1, 1]} : vector<8x128xf32> to vector<8x32xf32>
    %50 = math.tanh %49 : vector<8x32xf32>
    %51 = arith.mulf %47, %12 : vector<8x32xf32>
    %52 = arith.mulf %46, %50 : vector<8x32xf32>
    %53 = arith.addf %51, %52 : vector<8x32xf32>
    %54 = math.tanh %53 : vector<8x32xf32>
    %55 = arith.mulf %48, %54 : vector<8x32xf32>
    %56 = arith.truncf %55 : vector<8x32xf32> to vector<8x32xbf16>
    %cst_17 = arith.constant dense<0.000000e+00> : vector<8x128xf32>
    %57 = tpu.matmul %56, %1, %cst_17 {dimension_numbers = #tpu.dot_dimension_numbers<[1], [0], [0], [1], [0, 0, 1, 1], [], []>} : vector<8x32xbf16>, vector<32x128xbf16>, vector<8x128xf32> -> vector<8x128xf32>
    %58 = vector.extract_strided_slice %11 {offsets = [1, 0, 0], sizes = [1, 8, 128], strides = [1, 1, 1]} : vector<8x8x128xf32> to vector<1x8x128xf32>
    %59 = vector.shape_cast %58 : vector<1x8x128xf32> to vector<8x128xf32>
    %60 = vector.extract_strided_slice %36 {offsets = [0, 0], sizes = [8, 128], strides = [1, 1]} : vector<8x256xf32> to vector<8x128xf32>
    %61 = arith.addf %59, %60 : vector<8x128xf32>
    %62 = vector.extract_strided_slice %61 {offsets = [0, 0], sizes = [8, 96], strides = [1, 1]} : vector<8x128xf32> to vector<8x96xf32>
    %63 = arith.negf %62 : vector<8x96xf32>
    %64 = math.exp %63 : vector<8x96xf32>
    %cst_18 = arith.constant 1.000000e+00 : f32
    %65 = vector.broadcast %cst_18 : f32 to vector<8x96xf32>
    %66 = arith.addf %65, %64 : vector<8x96xf32>
    %67 = arith.divf %65, %66 : vector<8x96xf32>
    %68 = vector.extract_strided_slice %67 {offsets = [0, 0], sizes = [8, 32], strides = [1, 1]} : vector<8x96xf32> to vector<8x32xf32>
    %69 = vector.extract_strided_slice %67 {offsets = [0, 32], sizes = [8, 32], strides = [1, 1]} : vector<8x96xf32> to vector<8x32xf32>
    %70 = vector.extract_strided_slice %67 {offsets = [0, 64], sizes = [8, 32], strides = [1, 1]} : vector<8x96xf32> to vector<8x32xf32>
    %71 = vector.extract_strided_slice %61 {offsets = [0, 96], sizes = [8, 32], strides = [1, 1]} : vector<8x128xf32> to vector<8x32xf32>
    %72 = math.tanh %71 : vector<8x32xf32>
    %73 = arith.mulf %69, %32 : vector<8x32xf32>
    %74 = arith.mulf %68, %72 : vector<8x32xf32>
    %75 = arith.addf %73, %74 : vector<8x32xf32>
    %76 = math.tanh %75 : vector<8x32xf32>
    %77 = arith.mulf %70, %76 : vector<8x32xf32>
    %78 = arith.truncf %77 : vector<8x32xf32> to vector<8x32xbf16>
    %cst_19 = arith.constant dense<0.000000e+00> : vector<8x256xf32>
    %79 = tpu.matmul %78, %0, %cst_19 {dimension_numbers = #tpu.dot_dimension_numbers<[1], [0], [0], [1], [0, 0, 1, 1], [], []>} : vector<8x32xbf16>, vector<32x256xbf16>, vector<8x256xf32> -> vector<8x256xf32>
    %80 = vector.extract_strided_slice %79 {offsets = [0, 128], sizes = [8, 128], strides = [1, 1]} : vector<8x256xf32> to vector<8x128xf32>
    %81 = arith.addf %80, %57 : vector<8x128xf32>
    %82 = arith.addf %81, %4 : vector<8x128xf32>
    %83 = vector.extract_strided_slice %82 {offsets = [0, 0], sizes = [8, 96], strides = [1, 1]} : vector<8x128xf32> to vector<8x96xf32>
    %84 = arith.negf %83 : vector<8x96xf32>
    %85 = math.exp %84 : vector<8x96xf32>
    %cst_20 = arith.constant 1.000000e+00 : f32
    %86 = vector.broadcast %cst_20 : f32 to vector<8x96xf32>
    %87 = arith.addf %86, %85 : vector<8x96xf32>
    %88 = arith.divf %86, %87 : vector<8x96xf32>
    %89 = vector.extract_strided_slice %88 {offsets = [0, 0], sizes = [8, 32], strides = [1, 1]} : vector<8x96xf32> to vector<8x32xf32>
    %90 = vector.extract_strided_slice %88 {offsets = [0, 32], sizes = [8, 32], strides = [1, 1]} : vector<8x96xf32> to vector<8x32xf32>
    %91 = vector.extract_strided_slice %88 {offsets = [0, 64], sizes = [8, 32], strides = [1, 1]} : vector<8x96xf32> to vector<8x32xf32>
    %92 = vector.extract_strided_slice %82 {offsets = [0, 96], sizes = [8, 32], strides = [1, 1]} : vector<8x128xf32> to vector<8x32xf32>
    %93 = math.tanh %92 : vector<8x32xf32>
    %94 = arith.mulf %90, %53 : vector<8x32xf32>
    %95 = arith.mulf %89, %93 : vector<8x32xf32>
    %96 = arith.addf %94, %95 : vector<8x32xf32>
    %97 = math.tanh %96 : vector<8x32xf32>
    %98 = arith.mulf %91, %97 : vector<8x32xf32>
    %99 = arith.truncf %98 : vector<8x32xf32> to vector<8x32xbf16>
    %cst_21 = arith.constant dense<0.000000e+00> : vector<8x128xf32>
    %100 = tpu.matmul %99, %1, %cst_21 {dimension_numbers = #tpu.dot_dimension_numbers<[1], [0], [0], [1], [0, 0, 1, 1], [], []>} : vector<8x32xbf16>, vector<32x128xbf16>, vector<8x128xf32> -> vector<8x128xf32>
    %101 = vector.extract_strided_slice %11 {offsets = [2, 0, 0], sizes = [1, 8, 128], strides = [1, 1, 1]} : vector<8x8x128xf32> to vector<1x8x128xf32>
    %102 = vector.shape_cast %101 : vector<1x8x128xf32> to vector<8x128xf32>
    %103 = vector.extract_strided_slice %79 {offsets = [0, 0], sizes = [8, 128], strides = [1, 1]} : vector<8x256xf32> to vector<8x128xf32>
    %104 = arith.addf %102, %103 : vector<8x128xf32>
    %105 = vector.extract_strided_slice %104 {offsets = [0, 0], sizes = [8, 96], strides = [1, 1]} : vector<8x128xf32> to vector<8x96xf32>
    %106 = arith.negf %105 : vector<8x96xf32>
    %107 = math.exp %106 : vector<8x96xf32>
    %cst_22 = arith.constant 1.000000e+00 : f32
    %108 = vector.broadcast %cst_22 : f32 to vector<8x96xf32>
    %109 = arith.addf %108, %107 : vector<8x96xf32>
    %110 = arith.divf %108, %109 : vector<8x96xf32>
    %111 = vector.extract_strided_slice %110 {offsets = [0, 0], sizes = [8, 32], strides = [1, 1]} : vector<8x96xf32> to vector<8x32xf32>
    %112 = vector.extract_strided_slice %110 {offsets = [0, 32], sizes = [8, 32], strides = [1, 1]} : vector<8x96xf32> to vector<8x32xf32>
    %113 = vector.extract_strided_slice %110 {offsets = [0, 64], sizes = [8, 32], strides = [1, 1]} : vector<8x96xf32> to vector<8x32xf32>
    %114 = vector.extract_strided_slice %104 {offsets = [0, 96], sizes = [8, 32], strides = [1, 1]} : vector<8x128xf32> to vector<8x32xf32>
    %115 = math.tanh %114 : vector<8x32xf32>
    %116 = arith.mulf %112, %75 : vector<8x32xf32>
    %117 = arith.mulf %111, %115 : vector<8x32xf32>
    %118 = arith.addf %116, %117 : vector<8x32xf32>
    %119 = math.tanh %118 : vector<8x32xf32>
    %120 = arith.mulf %113, %119 : vector<8x32xf32>
    %121 = arith.truncf %120 : vector<8x32xf32> to vector<8x32xbf16>
    %cst_23 = arith.constant dense<0.000000e+00> : vector<8x256xf32>
    %122 = tpu.matmul %121, %0, %cst_23 {dimension_numbers = #tpu.dot_dimension_numbers<[1], [0], [0], [1], [0, 0, 1, 1], [], []>} : vector<8x32xbf16>, vector<32x256xbf16>, vector<8x256xf32> -> vector<8x256xf32>
    %123 = vector.extract_strided_slice %122 {offsets = [0, 128], sizes = [8, 128], strides = [1, 1]} : vector<8x256xf32> to vector<8x128xf32>
    %124 = arith.addf %123, %100 : vector<8x128xf32>
    %125 = arith.addf %124, %4 : vector<8x128xf32>
    %126 = vector.extract_strided_slice %125 {offsets = [0, 0], sizes = [8, 96], strides = [1, 1]} : vector<8x128xf32> to vector<8x96xf32>
    %127 = arith.negf %126 : vector<8x96xf32>
    %128 = math.exp %127 : vector<8x96xf32>
    %cst_24 = arith.constant 1.000000e+00 : f32
    %129 = vector.broadcast %cst_24 : f32 to vector<8x96xf32>
    %130 = arith.addf %129, %128 : vector<8x96xf32>
    %131 = arith.divf %129, %130 : vector<8x96xf32>
    %132 = vector.extract_strided_slice %131 {offsets = [0, 0], sizes = [8, 32], strides = [1, 1]} : vector<8x96xf32> to vector<8x32xf32>
    %133 = vector.extract_strided_slice %131 {offsets = [0, 32], sizes = [8, 32], strides = [1, 1]} : vector<8x96xf32> to vector<8x32xf32>
    %134 = vector.extract_strided_slice %131 {offsets = [0, 64], sizes = [8, 32], strides = [1, 1]} : vector<8x96xf32> to vector<8x32xf32>
    %135 = vector.extract_strided_slice %125 {offsets = [0, 96], sizes = [8, 32], strides = [1, 1]} : vector<8x128xf32> to vector<8x32xf32>
    %136 = math.tanh %135 : vector<8x32xf32>
    %137 = arith.mulf %133, %96 : vector<8x32xf32>
    %138 = arith.mulf %132, %136 : vector<8x32xf32>
    %139 = arith.addf %137, %138 : vector<8x32xf32>
    %140 = math.tanh %139 : vector<8x32xf32>
    %141 = arith.mulf %134, %140 : vector<8x32xf32>
    %142 = arith.truncf %141 : vector<8x32xf32> to vector<8x32xbf16>
    %cst_25 = arith.constant dense<0.000000e+00> : vector<8x128xf32>
    %143 = tpu.matmul %142, %1, %cst_25 {dimension_numbers = #tpu.dot_dimension_numbers<[1], [0], [0], [1], [0, 0, 1, 1], [], []>} : vector<8x32xbf16>, vector<32x128xbf16>, vector<8x128xf32> -> vector<8x128xf32>
    %144 = vector.extract_strided_slice %11 {offsets = [3, 0, 0], sizes = [1, 8, 128], strides = [1, 1, 1]} : vector<8x8x128xf32> to vector<1x8x128xf32>
    %145 = vector.shape_cast %144 : vector<1x8x128xf32> to vector<8x128xf32>
    %146 = vector.extract_strided_slice %122 {offsets = [0, 0], sizes = [8, 128], strides = [1, 1]} : vector<8x256xf32> to vector<8x128xf32>
    %147 = arith.addf %145, %146 : vector<8x128xf32>
    %148 = vector.extract_strided_slice %147 {offsets = [0, 0], sizes = [8, 96], strides = [1, 1]} : vector<8x128xf32> to vector<8x96xf32>
    %149 = arith.negf %148 : vector<8x96xf32>
    %150 = math.exp %149 : vector<8x96xf32>
    %cst_26 = arith.constant 1.000000e+00 : f32
    %151 = vector.broadcast %cst_26 : f32 to vector<8x96xf32>
    %152 = arith.addf %151, %150 : vector<8x96xf32>
    %153 = arith.divf %151, %152 : vector<8x96xf32>
    %154 = vector.extract_strided_slice %153 {offsets = [0, 0], sizes = [8, 32], strides = [1, 1]} : vector<8x96xf32> to vector<8x32xf32>
    %155 = vector.extract_strided_slice %153 {offsets = [0, 32], sizes = [8, 32], strides = [1, 1]} : vector<8x96xf32> to vector<8x32xf32>
    %156 = vector.extract_strided_slice %153 {offsets = [0, 64], sizes = [8, 32], strides = [1, 1]} : vector<8x96xf32> to vector<8x32xf32>
    %157 = vector.extract_strided_slice %147 {offsets = [0, 96], sizes = [8, 32], strides = [1, 1]} : vector<8x128xf32> to vector<8x32xf32>
    %158 = math.tanh %157 : vector<8x32xf32>
    %159 = arith.mulf %155, %118 : vector<8x32xf32>
    %160 = arith.mulf %154, %158 : vector<8x32xf32>
    %161 = arith.addf %159, %160 : vector<8x32xf32>
    %162 = math.tanh %161 : vector<8x32xf32>
    %163 = arith.mulf %156, %162 : vector<8x32xf32>
    %164 = arith.truncf %163 : vector<8x32xf32> to vector<8x32xbf16>
    %cst_27 = arith.constant dense<0.000000e+00> : vector<8x256xf32>
    %165 = tpu.matmul %164, %0, %cst_27 {dimension_numbers = #tpu.dot_dimension_numbers<[1], [0], [0], [1], [0, 0, 1, 1], [], []>} : vector<8x32xbf16>, vector<32x256xbf16>, vector<8x256xf32> -> vector<8x256xf32>
    %166 = vector.extract_strided_slice %165 {offsets = [0, 128], sizes = [8, 128], strides = [1, 1]} : vector<8x256xf32> to vector<8x128xf32>
    %167 = arith.addf %166, %143 : vector<8x128xf32>
    %168 = arith.addf %167, %4 : vector<8x128xf32>
    %169 = vector.extract_strided_slice %168 {offsets = [0, 0], sizes = [8, 96], strides = [1, 1]} : vector<8x128xf32> to vector<8x96xf32>
    %170 = arith.negf %169 : vector<8x96xf32>
    %171 = math.exp %170 : vector<8x96xf32>
    %cst_28 = arith.constant 1.000000e+00 : f32
    %172 = vector.broadcast %cst_28 : f32 to vector<8x96xf32>
    %173 = arith.addf %172, %171 : vector<8x96xf32>
    %174 = arith.divf %172, %173 : vector<8x96xf32>
    %175 = vector.extract_strided_slice %174 {offsets = [0, 0], sizes = [8, 32], strides = [1, 1]} : vector<8x96xf32> to vector<8x32xf32>
    %176 = vector.extract_strided_slice %174 {offsets = [0, 32], sizes = [8, 32], strides = [1, 1]} : vector<8x96xf32> to vector<8x32xf32>
    %177 = vector.extract_strided_slice %174 {offsets = [0, 64], sizes = [8, 32], strides = [1, 1]} : vector<8x96xf32> to vector<8x32xf32>
    %178 = vector.extract_strided_slice %168 {offsets = [0, 96], sizes = [8, 32], strides = [1, 1]} : vector<8x128xf32> to vector<8x32xf32>
    %179 = math.tanh %178 : vector<8x32xf32>
    %180 = arith.mulf %176, %139 : vector<8x32xf32>
    %181 = arith.mulf %175, %179 : vector<8x32xf32>
    %182 = arith.addf %180, %181 : vector<8x32xf32>
    %183 = math.tanh %182 : vector<8x32xf32>
    %184 = arith.mulf %177, %183 : vector<8x32xf32>
    %185 = arith.truncf %184 : vector<8x32xf32> to vector<8x32xbf16>
    %cst_29 = arith.constant dense<0.000000e+00> : vector<8x128xf32>
    %186 = tpu.matmul %185, %1, %cst_29 {dimension_numbers = #tpu.dot_dimension_numbers<[1], [0], [0], [1], [0, 0, 1, 1], [], []>} : vector<8x32xbf16>, vector<32x128xbf16>, vector<8x128xf32> -> vector<8x128xf32>
    %187 = vector.extract_strided_slice %11 {offsets = [4, 0, 0], sizes = [1, 8, 128], strides = [1, 1, 1]} : vector<8x8x128xf32> to vector<1x8x128xf32>
    %188 = vector.shape_cast %187 : vector<1x8x128xf32> to vector<8x128xf32>
    %189 = vector.extract_strided_slice %165 {offsets = [0, 0], sizes = [8, 128], strides = [1, 1]} : vector<8x256xf32> to vector<8x128xf32>
    %190 = arith.addf %188, %189 : vector<8x128xf32>
    %191 = vector.extract_strided_slice %190 {offsets = [0, 0], sizes = [8, 96], strides = [1, 1]} : vector<8x128xf32> to vector<8x96xf32>
    %192 = arith.negf %191 : vector<8x96xf32>
    %193 = math.exp %192 : vector<8x96xf32>
    %cst_30 = arith.constant 1.000000e+00 : f32
    %194 = vector.broadcast %cst_30 : f32 to vector<8x96xf32>
    %195 = arith.addf %194, %193 : vector<8x96xf32>
    %196 = arith.divf %194, %195 : vector<8x96xf32>
    %197 = vector.extract_strided_slice %196 {offsets = [0, 0], sizes = [8, 32], strides = [1, 1]} : vector<8x96xf32> to vector<8x32xf32>
    %198 = vector.extract_strided_slice %196 {offsets = [0, 32], sizes = [8, 32], strides = [1, 1]} : vector<8x96xf32> to vector<8x32xf32>
    %199 = vector.extract_strided_slice %196 {offsets = [0, 64], sizes = [8, 32], strides = [1, 1]} : vector<8x96xf32> to vector<8x32xf32>
    %200 = vector.extract_strided_slice %190 {offsets = [0, 96], sizes = [8, 32], strides = [1, 1]} : vector<8x128xf32> to vector<8x32xf32>
    %201 = math.tanh %200 : vector<8x32xf32>
    %202 = arith.mulf %198, %161 : vector<8x32xf32>
    %203 = arith.mulf %197, %201 : vector<8x32xf32>
    %204 = arith.addf %202, %203 : vector<8x32xf32>
    %205 = math.tanh %204 : vector<8x32xf32>
    %206 = arith.mulf %199, %205 : vector<8x32xf32>
    %207 = arith.truncf %206 : vector<8x32xf32> to vector<8x32xbf16>
    %cst_31 = arith.constant dense<0.000000e+00> : vector<8x256xf32>
    %208 = tpu.matmul %207, %0, %cst_31 {dimension_numbers = #tpu.dot_dimension_numbers<[1], [0], [0], [1], [0, 0, 1, 1], [], []>} : vector<8x32xbf16>, vector<32x256xbf16>, vector<8x256xf32> -> vector<8x256xf32>
    %209 = vector.extract_strided_slice %208 {offsets = [0, 128], sizes = [8, 128], strides = [1, 1]} : vector<8x256xf32> to vector<8x128xf32>
    %210 = arith.addf %209, %186 : vector<8x128xf32>
    %211 = arith.addf %210, %4 : vector<8x128xf32>
    %212 = vector.extract_strided_slice %211 {offsets = [0, 0], sizes = [8, 96], strides = [1, 1]} : vector<8x128xf32> to vector<8x96xf32>
    %213 = arith.negf %212 : vector<8x96xf32>
    %214 = math.exp %213 : vector<8x96xf32>
    %cst_32 = arith.constant 1.000000e+00 : f32
    %215 = vector.broadcast %cst_32 : f32 to vector<8x96xf32>
    %216 = arith.addf %215, %214 : vector<8x96xf32>
    %217 = arith.divf %215, %216 : vector<8x96xf32>
    %218 = vector.extract_strided_slice %217 {offsets = [0, 0], sizes = [8, 32], strides = [1, 1]} : vector<8x96xf32> to vector<8x32xf32>
    %219 = vector.extract_strided_slice %217 {offsets = [0, 32], sizes = [8, 32], strides = [1, 1]} : vector<8x96xf32> to vector<8x32xf32>
    %220 = vector.extract_strided_slice %217 {offsets = [0, 64], sizes = [8, 32], strides = [1, 1]} : vector<8x96xf32> to vector<8x32xf32>
    %221 = vector.extract_strided_slice %211 {offsets = [0, 96], sizes = [8, 32], strides = [1, 1]} : vector<8x128xf32> to vector<8x32xf32>
    %222 = math.tanh %221 : vector<8x32xf32>
    %223 = arith.mulf %219, %182 : vector<8x32xf32>
    %224 = arith.mulf %218, %222 : vector<8x32xf32>
    %225 = arith.addf %223, %224 : vector<8x32xf32>
    %226 = math.tanh %225 : vector<8x32xf32>
    %227 = arith.mulf %220, %226 : vector<8x32xf32>
    %228 = arith.truncf %227 : vector<8x32xf32> to vector<8x32xbf16>
    %cst_33 = arith.constant dense<0.000000e+00> : vector<8x128xf32>
    %229 = tpu.matmul %228, %1, %cst_33 {dimension_numbers = #tpu.dot_dimension_numbers<[1], [0], [0], [1], [0, 0, 1, 1], [], []>} : vector<8x32xbf16>, vector<32x128xbf16>, vector<8x128xf32> -> vector<8x128xf32>
    %230 = vector.extract_strided_slice %11 {offsets = [5, 0, 0], sizes = [1, 8, 128], strides = [1, 1, 1]} : vector<8x8x128xf32> to vector<1x8x128xf32>
    %231 = vector.shape_cast %230 : vector<1x8x128xf32> to vector<8x128xf32>
    %232 = vector.extract_strided_slice %208 {offsets = [0, 0], sizes = [8, 128], strides = [1, 1]} : vector<8x256xf32> to vector<8x128xf32>
    %233 = arith.addf %231, %232 : vector<8x128xf32>
    %234 = vector.extract_strided_slice %233 {offsets = [0, 0], sizes = [8, 96], strides = [1, 1]} : vector<8x128xf32> to vector<8x96xf32>
    %235 = arith.negf %234 : vector<8x96xf32>
    %236 = math.exp %235 : vector<8x96xf32>
    %cst_34 = arith.constant 1.000000e+00 : f32
    %237 = vector.broadcast %cst_34 : f32 to vector<8x96xf32>
    %238 = arith.addf %237, %236 : vector<8x96xf32>
    %239 = arith.divf %237, %238 : vector<8x96xf32>
    %240 = vector.extract_strided_slice %239 {offsets = [0, 0], sizes = [8, 32], strides = [1, 1]} : vector<8x96xf32> to vector<8x32xf32>
    %241 = vector.extract_strided_slice %239 {offsets = [0, 32], sizes = [8, 32], strides = [1, 1]} : vector<8x96xf32> to vector<8x32xf32>
    %242 = vector.extract_strided_slice %239 {offsets = [0, 64], sizes = [8, 32], strides = [1, 1]} : vector<8x96xf32> to vector<8x32xf32>
    %243 = vector.extract_strided_slice %233 {offsets = [0, 96], sizes = [8, 32], strides = [1, 1]} : vector<8x128xf32> to vector<8x32xf32>
    %244 = math.tanh %243 : vector<8x32xf32>
    %245 = arith.mulf %241, %204 : vector<8x32xf32>
    %246 = arith.mulf %240, %244 : vector<8x32xf32>
    %247 = arith.addf %245, %246 : vector<8x32xf32>
    %248 = math.tanh %247 : vector<8x32xf32>
    %249 = arith.mulf %242, %248 : vector<8x32xf32>
    %250 = arith.truncf %249 : vector<8x32xf32> to vector<8x32xbf16>
    %cst_35 = arith.constant dense<0.000000e+00> : vector<8x256xf32>
    %251 = tpu.matmul %250, %0, %cst_35 {dimension_numbers = #tpu.dot_dimension_numbers<[1], [0], [0], [1], [0, 0, 1, 1], [], []>} : vector<8x32xbf16>, vector<32x256xbf16>, vector<8x256xf32> -> vector<8x256xf32>
    %252 = vector.extract_strided_slice %251 {offsets = [0, 128], sizes = [8, 128], strides = [1, 1]} : vector<8x256xf32> to vector<8x128xf32>
    %253 = arith.addf %252, %229 : vector<8x128xf32>
    %254 = arith.addf %253, %4 : vector<8x128xf32>
    %255 = vector.extract_strided_slice %254 {offsets = [0, 0], sizes = [8, 96], strides = [1, 1]} : vector<8x128xf32> to vector<8x96xf32>
    %256 = arith.negf %255 : vector<8x96xf32>
    %257 = math.exp %256 : vector<8x96xf32>
    %cst_36 = arith.constant 1.000000e+00 : f32
    %258 = vector.broadcast %cst_36 : f32 to vector<8x96xf32>
    %259 = arith.addf %258, %257 : vector<8x96xf32>
    %260 = arith.divf %258, %259 : vector<8x96xf32>
    %261 = vector.extract_strided_slice %260 {offsets = [0, 0], sizes = [8, 32], strides = [1, 1]} : vector<8x96xf32> to vector<8x32xf32>
    %262 = vector.extract_strided_slice %260 {offsets = [0, 32], sizes = [8, 32], strides = [1, 1]} : vector<8x96xf32> to vector<8x32xf32>
    %263 = vector.extract_strided_slice %260 {offsets = [0, 64], sizes = [8, 32], strides = [1, 1]} : vector<8x96xf32> to vector<8x32xf32>
    %264 = vector.extract_strided_slice %254 {offsets = [0, 96], sizes = [8, 32], strides = [1, 1]} : vector<8x128xf32> to vector<8x32xf32>
    %265 = math.tanh %264 : vector<8x32xf32>
    %266 = arith.mulf %262, %225 : vector<8x32xf32>
    %267 = arith.mulf %261, %265 : vector<8x32xf32>
    %268 = arith.addf %266, %267 : vector<8x32xf32>
    %269 = math.tanh %268 : vector<8x32xf32>
    %270 = arith.mulf %263, %269 : vector<8x32xf32>
    %271 = arith.truncf %270 : vector<8x32xf32> to vector<8x32xbf16>
    %cst_37 = arith.constant dense<0.000000e+00> : vector<8x128xf32>
    %272 = tpu.matmul %271, %1, %cst_37 {dimension_numbers = #tpu.dot_dimension_numbers<[1], [0], [0], [1], [0, 0, 1, 1], [], []>} : vector<8x32xbf16>, vector<32x128xbf16>, vector<8x128xf32> -> vector<8x128xf32>
    %273 = vector.extract_strided_slice %11 {offsets = [6, 0, 0], sizes = [1, 8, 128], strides = [1, 1, 1]} : vector<8x8x128xf32> to vector<1x8x128xf32>
    %274 = vector.shape_cast %273 : vector<1x8x128xf32> to vector<8x128xf32>
    %275 = vector.extract_strided_slice %251 {offsets = [0, 0], sizes = [8, 128], strides = [1, 1]} : vector<8x256xf32> to vector<8x128xf32>
    %276 = arith.addf %274, %275 : vector<8x128xf32>
    %277 = vector.extract_strided_slice %276 {offsets = [0, 0], sizes = [8, 96], strides = [1, 1]} : vector<8x128xf32> to vector<8x96xf32>
    %278 = arith.negf %277 : vector<8x96xf32>
    %279 = math.exp %278 : vector<8x96xf32>
    %cst_38 = arith.constant 1.000000e+00 : f32
    %280 = vector.broadcast %cst_38 : f32 to vector<8x96xf32>
    %281 = arith.addf %280, %279 : vector<8x96xf32>
    %282 = arith.divf %280, %281 : vector<8x96xf32>
    %283 = vector.extract_strided_slice %282 {offsets = [0, 0], sizes = [8, 32], strides = [1, 1]} : vector<8x96xf32> to vector<8x32xf32>
    %284 = vector.extract_strided_slice %282 {offsets = [0, 32], sizes = [8, 32], strides = [1, 1]} : vector<8x96xf32> to vector<8x32xf32>
    %285 = vector.extract_strided_slice %282 {offsets = [0, 64], sizes = [8, 32], strides = [1, 1]} : vector<8x96xf32> to vector<8x32xf32>
    %286 = vector.extract_strided_slice %276 {offsets = [0, 96], sizes = [8, 32], strides = [1, 1]} : vector<8x128xf32> to vector<8x32xf32>
    %287 = math.tanh %286 : vector<8x32xf32>
    %288 = arith.mulf %284, %247 : vector<8x32xf32>
    %289 = arith.mulf %283, %287 : vector<8x32xf32>
    %290 = arith.addf %288, %289 : vector<8x32xf32>
    %291 = math.tanh %290 : vector<8x32xf32>
    %292 = arith.mulf %285, %291 : vector<8x32xf32>
    %293 = arith.truncf %292 : vector<8x32xf32> to vector<8x32xbf16>
    %cst_39 = arith.constant dense<0.000000e+00> : vector<8x256xf32>
    %294 = tpu.matmul %293, %0, %cst_39 {dimension_numbers = #tpu.dot_dimension_numbers<[1], [0], [0], [1], [0, 0, 1, 1], [], []>} : vector<8x32xbf16>, vector<32x256xbf16>, vector<8x256xf32> -> vector<8x256xf32>
    %295 = vector.extract_strided_slice %294 {offsets = [0, 128], sizes = [8, 128], strides = [1, 1]} : vector<8x256xf32> to vector<8x128xf32>
    %296 = arith.addf %295, %272 : vector<8x128xf32>
    %297 = arith.addf %296, %4 : vector<8x128xf32>
    %298 = vector.extract_strided_slice %297 {offsets = [0, 0], sizes = [8, 96], strides = [1, 1]} : vector<8x128xf32> to vector<8x96xf32>
    %299 = arith.negf %298 : vector<8x96xf32>
    %300 = math.exp %299 : vector<8x96xf32>
    %cst_40 = arith.constant 1.000000e+00 : f32
    %301 = vector.broadcast %cst_40 : f32 to vector<8x96xf32>
    %302 = arith.addf %301, %300 : vector<8x96xf32>
    %303 = arith.divf %301, %302 : vector<8x96xf32>
    %304 = vector.extract_strided_slice %303 {offsets = [0, 0], sizes = [8, 32], strides = [1, 1]} : vector<8x96xf32> to vector<8x32xf32>
    %305 = vector.extract_strided_slice %303 {offsets = [0, 32], sizes = [8, 32], strides = [1, 1]} : vector<8x96xf32> to vector<8x32xf32>
    %306 = vector.extract_strided_slice %303 {offsets = [0, 64], sizes = [8, 32], strides = [1, 1]} : vector<8x96xf32> to vector<8x32xf32>
    %307 = vector.extract_strided_slice %297 {offsets = [0, 96], sizes = [8, 32], strides = [1, 1]} : vector<8x128xf32> to vector<8x32xf32>
    %308 = math.tanh %307 : vector<8x32xf32>
    %309 = arith.mulf %305, %268 : vector<8x32xf32>
    %310 = arith.mulf %304, %308 : vector<8x32xf32>
    %311 = arith.addf %309, %310 : vector<8x32xf32>
    %312 = math.tanh %311 : vector<8x32xf32>
    %313 = arith.mulf %306, %312 : vector<8x32xf32>
    %314 = arith.truncf %313 : vector<8x32xf32> to vector<8x32xbf16>
    %cst_41 = arith.constant dense<0.000000e+00> : vector<8x128xf32>
    %315 = tpu.matmul %314, %1, %cst_41 {dimension_numbers = #tpu.dot_dimension_numbers<[1], [0], [0], [1], [0, 0, 1, 1], [], []>} : vector<8x32xbf16>, vector<32x128xbf16>, vector<8x128xf32> -> vector<8x128xf32>
    %316 = vector.extract_strided_slice %11 {offsets = [7, 0, 0], sizes = [1, 8, 128], strides = [1, 1, 1]} : vector<8x8x128xf32> to vector<1x8x128xf32>
    %317 = vector.shape_cast %316 : vector<1x8x128xf32> to vector<8x128xf32>
    %318 = vector.extract_strided_slice %294 {offsets = [0, 0], sizes = [8, 128], strides = [1, 1]} : vector<8x256xf32> to vector<8x128xf32>
    %319 = arith.addf %317, %318 : vector<8x128xf32>
    %320 = vector.extract_strided_slice %319 {offsets = [0, 0], sizes = [8, 96], strides = [1, 1]} : vector<8x128xf32> to vector<8x96xf32>
    %321 = arith.negf %320 : vector<8x96xf32>
    %322 = math.exp %321 : vector<8x96xf32>
    %cst_42 = arith.constant 1.000000e+00 : f32
    %323 = vector.broadcast %cst_42 : f32 to vector<8x96xf32>
    %324 = arith.addf %323, %322 : vector<8x96xf32>
    %325 = arith.divf %323, %324 : vector<8x96xf32>
    %326 = vector.extract_strided_slice %325 {offsets = [0, 0], sizes = [8, 32], strides = [1, 1]} : vector<8x96xf32> to vector<8x32xf32>
    %327 = vector.extract_strided_slice %325 {offsets = [0, 32], sizes = [8, 32], strides = [1, 1]} : vector<8x96xf32> to vector<8x32xf32>
    %328 = vector.extract_strided_slice %325 {offsets = [0, 64], sizes = [8, 32], strides = [1, 1]} : vector<8x96xf32> to vector<8x32xf32>
    %329 = vector.extract_strided_slice %319 {offsets = [0, 96], sizes = [8, 32], strides = [1, 1]} : vector<8x128xf32> to vector<8x32xf32>
    %330 = math.tanh %329 : vector<8x32xf32>
    %331 = arith.mulf %327, %290 : vector<8x32xf32>
    %332 = arith.mulf %326, %330 : vector<8x32xf32>
    %333 = arith.addf %331, %332 : vector<8x32xf32>
    %334 = math.tanh %333 : vector<8x32xf32>
    %335 = arith.mulf %328, %334 : vector<8x32xf32>
    %336 = arith.truncf %335 : vector<8x32xf32> to vector<8x32xbf16>
    %cst_43 = arith.constant dense<0.000000e+00> : vector<8x256xf32>
    %337 = tpu.matmul %336, %0, %cst_43 {dimension_numbers = #tpu.dot_dimension_numbers<[1], [0], [0], [1], [0, 0, 1, 1], [], []>} : vector<8x32xbf16>, vector<32x256xbf16>, vector<8x256xf32> -> vector<8x256xf32>
    %338 = vector.extract_strided_slice %337 {offsets = [0, 128], sizes = [8, 128], strides = [1, 1]} : vector<8x256xf32> to vector<8x128xf32>
    %339 = arith.addf %338, %315 : vector<8x128xf32>
    %340 = arith.addf %339, %4 : vector<8x128xf32>
    %341 = vector.extract_strided_slice %340 {offsets = [0, 0], sizes = [8, 96], strides = [1, 1]} : vector<8x128xf32> to vector<8x96xf32>
    %342 = arith.negf %341 : vector<8x96xf32>
    %343 = math.exp %342 : vector<8x96xf32>
    %cst_44 = arith.constant 1.000000e+00 : f32
    %344 = vector.broadcast %cst_44 : f32 to vector<8x96xf32>
    %345 = arith.addf %344, %343 : vector<8x96xf32>
    %346 = arith.divf %344, %345 : vector<8x96xf32>
    %347 = vector.extract_strided_slice %346 {offsets = [0, 0], sizes = [8, 32], strides = [1, 1]} : vector<8x96xf32> to vector<8x32xf32>
    %348 = vector.extract_strided_slice %346 {offsets = [0, 32], sizes = [8, 32], strides = [1, 1]} : vector<8x96xf32> to vector<8x32xf32>
    %349 = vector.extract_strided_slice %346 {offsets = [0, 64], sizes = [8, 32], strides = [1, 1]} : vector<8x96xf32> to vector<8x32xf32>
    %350 = vector.extract_strided_slice %340 {offsets = [0, 96], sizes = [8, 32], strides = [1, 1]} : vector<8x128xf32> to vector<8x32xf32>
    %351 = math.tanh %350 : vector<8x32xf32>
    %352 = arith.mulf %348, %311 : vector<8x32xf32>
    %353 = arith.mulf %347, %351 : vector<8x32xf32>
    %354 = arith.addf %352, %353 : vector<8x32xf32>
    %355 = math.tanh %354 : vector<8x32xf32>
    %356 = arith.mulf %349, %355 : vector<8x32xf32>
    %357 = arith.truncf %356 : vector<8x32xf32> to vector<8x32xbf16>
    %c0_45 = arith.constant 0 : index
    %c0_46 = arith.constant 0 : index
    %358 = vector.load %arg6[%c0_45, %c0_46] : memref<32x16xbf16, #tpu.memory_space<vmem>>, vector<32x16xbf16>
    %cst_47 = arith.constant dense<0.000000e+00> : vector<8x16xf32>
    %359 = tpu.matmul %357, %358, %cst_47 {dimension_numbers = #tpu.dot_dimension_numbers<[1], [0], [0], [1], [0, 0, 1, 1], [], []>} : vector<8x32xbf16>, vector<32x16xbf16>, vector<8x16xf32> -> vector<8x16xf32>
    %c0_48 = arith.constant 0 : index
    %c0_49 = arith.constant 0 : index
    %360 = vector.load %arg7[%c0_48, %c0_49] : memref<1x16xf32, #tpu.memory_space<vmem>>, vector<1x16xf32>
    %361 = vector.broadcast %360 : vector<1x16xf32> to vector<8x16xf32>
    %362 = arith.addf %359, %361 : vector<8x16xf32>
    %cst_50 = arith.constant 0.000000e+00 : f32
    %363 = vector.broadcast %cst_50 : f32 to vector<8x16xf32>
    %364 = arith.maximumf %362, %363 : vector<8x16xf32>
    %365 = arith.truncf %364 : vector<8x16xf32> to vector<8x16xbf16>
    %c0_51 = arith.constant 0 : index
    %c0_52 = arith.constant 0 : index
    %366 = vector.load %arg8[%c0_51, %c0_52] : memref<16x128xbf16, #tpu.memory_space<vmem>>, vector<16x128xbf16>
    %cst_53 = arith.constant dense<0.000000e+00> : vector<8x128xf32>
    %367 = tpu.matmul %365, %366, %cst_53 {dimension_numbers = #tpu.dot_dimension_numbers<[1], [0], [0], [1], [0, 0, 1, 1], [], []>} : vector<8x16xbf16>, vector<16x128xbf16>, vector<8x128xf32> -> vector<8x128xf32>
    %c0_54 = arith.constant 0 : index
    %c0_55 = arith.constant 0 : index
    %368 = vector.load %arg9[%c0_54, %c0_55] : memref<1x128xf32, #tpu.memory_space<vmem>>, vector<1x128xf32>
    %369 = vector.broadcast %368 : vector<1x128xf32> to vector<8x128xf32>
    %370 = arith.addf %367, %369 : vector<8x128xf32>
    %c0_56 = arith.constant 0 : index
    %c0_57 = arith.constant 0 : index
    %371 = vector.load %arg10[%c0_56, %c0_57] : memref<8x128xf32, #tpu.memory_space<vmem>>, vector<8x128xf32>
    tpu.vector_store %arg10[%c0_56, %c0_57], %370 {strides = array<i32>} : memref<8x128xf32, #tpu.memory_space<vmem>>, vector<8x128xf32>,
    return
  }
}

</mosaic_0001>

<bundles_post_ra>
// kernel: tpu_custom_call.1
= control target key start
LH: loop header
LB: loop body
LE: loop exit
PB: predicated region body
PF: predicated region fallthrough
CT: control target
= control target key end

     0   :  { %vm95_vm0 = vcmask 1041408   ;;  %vm82_vm1 = vcmask 31744   ;;  %s1890_s0 = inlined_call_operand.vmem [shape: bf16[64,4], index: 0, kind: input, shape index: {}]   ;;  %s1891_s1 = inlined_call_operand.vmem [shape: bf16[4,128], index: 1, kind: input, shape index: {}]   ;;  %s1892_s2 = inlined_call_operand.vmem [shape: f32[1,128], index: 2, kind: input, shape index: {}]   ;;  %s1893_s3 = inlined_call_operand.vmem [shape: bf16[32,256], index: 3, kind: input, shape index: {}]   ;;  %s1894_s4 = inlined_call_operand.vmem [shape: bf16[32,128], index: 4, kind: input, shape index: {}]   ;;  %s1895_s5 = inlined_call_operand.vmem [shape: f32[1,128], index: 5, kind: input, shape index: {}]   ;;  %s1896_s6 = inlined_call_operand.vmem [shape: bf16[32,16], index: 6, kind: input, shape index: {}]   ;;  %s1897_s7 = inlined_call_operand.vmem [shape: f32[1,16], index: 7, kind: input, shape index: {}]   ;;  %s1898_s8 = inlined_call_operand.vmem [shape: bf16[16,128], index: 8, kind: input, shape index: {}]   ;;  %s1899_s9 = inlined_call_operand.vmem [shape: f32[1,128], index: 9, kind: input, shape index: {}]   ;;  %s1900_s10 = inlined_call_operand.hbm [shape: f32[8,128], index: 10, kind: output, shape index: {}]  }
   0x1   :  { %v57_v0 = vld [vmem:[%s1891_s1] sm:$0x3] }
   0x2   :  { %v97_v1 = vsel %vm95_vm0, %v57_v0, 0  ;;  %v1358_v2 = vld [vmem:[%s1890_s0] sm:$0xff] }
   0x3   :  { %106 = vmatpush.bf16.msra.mxu0 %v97_v1 }
   0x4   :  { %15 = vsyncpa [#allocation3], 0  ;;  %v1596_v3 = vld [vmem:[%s1892_s2] ss:$0 sm:$0xff]  ;;  %s1528_s1 = smov 32   ;;  %vm190_vm6 = vcmask 261120  }
   0x5   :  { %v1287_v26 = vld [vmem:[%s1893_s3 + $0x10] sm:$0xf]  ;;  %v1355_v27 = vld [vmem:[%s1893_s3 + $0x14] sm:$0xf0]  ;;  %v1354_v28 = vld [vmem:[%s1893_s3 + $0x14] sm:$0xf] }
   0x6   :  { %1272 = vmatmul.msk.bf16.vlgmr.msra.gmra.mxu0 %vm82_vm1, %v1358_v2  ;;  %v1614_v29 = vor.u32 %v1355_v27, %v1287_v26  ;;  %v1289_v30 = vld [vmem:[%s1893_s3 + $0x18] sm:$0xf0]  ;;  %v1279_v31 = vld [vmem:[%s1893_s3] sm:$0xf]  ;;  %v1353_v32 = vld [vmem:[%s1893_s3 + $0x4] sm:$0xf0] }
   0x7   :  { %v1625_v33 = vor.u32 %v1354_v28, %v1289_v30  ;;  %v1352_v34 = vld [vmem:[%s1893_s3 + $0x4] sm:$0xf]  ;;  %v1281_v35 = vld [vmem:[%s1893_s3 + $0x8] sm:$0xf0]  ;;  %v1634_v36 = vor.u32 %v1353_v32, %v1279_v31  ;;  %s1529_s3 = smov 64   ;;  %s1247_s17 = sshll.u32 %s1900_s10, 4  ;;  %s1248_s17 = int_to_ptr.hbm [resolvable:$true] %s1247_s17 }
   0x8   :  { %200 = vmatpush.bf16.msra.mxu1 %v1614_v29  ;;  %732 = vmatpush.bf16.msrb.mxu0 %v1614_v29  ;;  %v1638_v37 = vor.u32 %v1352_v34, %v1281_v35  ;;  %v1659_v43 = vld [vmem:[%s1895_s5] ss:$0 sm:$0xff]  ;;  %v1359_v34 = vld [vmem:[%s1890_s0 + $0x8] sm:$0xff] }
   0x9   :  { %213 = vmatpush.bf16.msra.mxu2 %v1625_v33  ;;  %v1689_v35 = vld [vmem:[%s1894_s4] sm:$0xff] }
   0xc   :  { %201 = vmatpush.bf16.msra.mxu1 %v1634_v36  ;;  %733 = vmatpush.bf16.msrb.mxu0 %v1634_v36 }
   0xd   :  { %214 = vmatpush.bf16.msra.mxu2 %v1638_v37 }
  0x10   :  { %342 = vmatpush.bf16.msrb.mxu1 %v1614_v29  ;;  %875 = vmatpush.bf16.msra.mxu0 %v1625_v33 }
  0x11   :  { %355 = vmatpush.bf16.msrb.mxu2 %v1625_v33 }
  0x14   :  { %343 = vmatpush.bf16.msrb.mxu1 %v1634_v36  ;;  %876 = vmatpush.bf16.msra.mxu0 %v1638_v37 }
  0x15   :  { %356 = vmatpush.bf16.msrb.mxu2 %v1638_v37 }
  0x16   :  { %1273 = vmatmul.msk.bf16.gmra.mxu0 %vm82_vm1, %v1359_v34 }
  0x83   :  { %v108_v4 = vpop.f32.mrf.mxu0 }
  0x84   :  { %v109_v5 = vadd.f32 %v1596_v3, %v108_v4 }
  0x86   :  { %1372 = vtanh.f32 %v109_v5  ;;  %v1276_v7 = vmul.f32 -1.442695, %v109_v5 }
  0x88   :  { %1374 = vpow2.f32 %v1276_v7 }
  0x8b   :  { %v110_v46 = vpop.f32.mrf.mxu0 }
  0x8c   :  { %v1373_v6 = vpop.eup %1372  ;;  %v111_v48 = vadd.f32 %v1596_v3, %v110_v46 }
  0x8d   :  { %151 = vrot.lane.b32.xlu0 %v1373_v6, %s1528_s1 }
  0x8e   :  { %v1375_v8 = vpop.eup %1374 }
  0x8f   :  { %v132_v9 = vadd.f32 1.0, %v1375_v8 }
  0x91   :  { %1376 = vrcp.f32 %v132_v9  ;;  %v144_v15 = vand.u32 2147483648, %v132_v9  ;;  %vm138_vm3 = vweird.f32 %v132_v9  ;;  %v142_v16 = vand.u32 2147483647, %v132_v9 }
  0x93   :  { %v145_v18 = vor.u32 1.1754944e-38, %v144_v15  ;;  %vm143_vm5 = vcmp.eq.f32.partialorder %v142_v16, 8.507059e+37 }
  0x97   :  { %v1377_v10 = vpop.eup %1376 }
  0x98   :  { %v134_v11 = vmul.f32 %v1377_v10, %v132_v9  ;;  %vm139_vm2 = vweird.f32 %v1377_v10 }
  0x99   :  { %vm140_vm4 = vmor %vm138_vm3, %vm139_vm2 }
  0x9a   :  { %v135_v12 = vsub.f32 1.0, %v134_v11 }
  0x9c   :  { %v136_v13 = vmul.f32 %v1377_v10, %v135_v12 }
  0x9e   :  { %v137_v14 = vadd.f32 %v1377_v10, %v136_v13 }
  0xa0   :  { %v141_v17 = vsel %vm140_vm4, %v1377_v10, %v137_v14 }
  0xa1   :  { %v146_v20 = vsel %vm143_vm5, %v145_v18, %v141_v17 }
  0xa2   :  { %v149_v22 = vmul.f32 0.0, %v146_v20 }
  0xff   :  { %v152_v19 = vpop.permute.xlu0 %151 }
 0x100   :  { %v154_v21 = vmul.f32 %v152_v19, %v146_v20 }
 0x102   :  { %156 = vrot.lane.b32.xlu0 %v154_v21, %s1528_s1 }
 0x174   :  { %v157_v23 = vpop.permute.xlu0 %156 }
 0x175   :  { %v1601_v24 = vadd.f32 %v157_v23, %v149_v22 }
 0x177   :  { %1378 = vtanh.f32 %v1601_v24 }
 0x17d   :  { %v1379_v25 = vpop.eup %1378 }
 0x17e   :  { %162 = vrot.lane.b32.xlu1 %v1379_v25, %s1528_s1 }
 0x1f0   :  { %v163_v38 = vpop.permute.xlu1 %162 }
 0x1f1   :  { %v165_v39 = vmul.f32 %v163_v38, %v146_v20 }
 0x1f3   :  { %v166_v40 = vpack.c.bf16 %v165_v39, %v165_v39 }
 0x1f5   :  { %168 = vrot.lane.b32.xlu1 %v166_v40, %s1529_s3 }
 0x267   :  { %v169_v41 = vpop.permute.xlu1 %168 }
 0x268   :  { %1293 = vmatmul.msk.bf16.vlgmr.msra.gmra.mxu1 %vm190_vm6, %v169_v41  ;;  %1294 = vmatmul.msk.bf16.vlgmr.msra.gmra.mxu2 %vm190_vm6, %v169_v41 }
 0x269   :  { %472 = vmatpush.bf16.msra.mxu1 %v1614_v29  ;;  %485 = vmatpush.bf16.msra.mxu2 %v1625_v33 }
 0x26d   :  { %473 = vmatpush.bf16.msra.mxu1 %v1634_v36  ;;  %486 = vmatpush.bf16.msra.mxu2 %v1638_v37 }
 0x2e5   :  { %v203_v42 = vpop.f32.mrf.mxu1 }
 0x2e6   :  { %v291_v49 = vadd.f32 %v203_v42, %v111_v48 }
 0x2e8   :  { %v1305_v54 = vmul.f32 -1.442695, %v291_v49 }
 0x2eb   :  { %v216_v44 = vpop.f32.mrf.mxu2 }
 0x2ec   :  { %v221_v45 = vadd.f32 %v1659_v43, %v216_v44  ;;  %v113_v44 = vpop.f32.mrf.mxu0 }
 0x2ed   :  { %v205_v47 = vpop.f32.mrf.mxu1 }
 0x2ee   :  { %1380 = vtanh.f32 %v221_v45  ;;  %v1295_v53 = vmul.f32 -1.442695, %v221_v45  ;;  %v114_v45 = vadd.f32 %v1596_v3, %v113_v44 }
 0x2ef   :  { %1382 = vtanh.f32 %v291_v49 }
 0x2f0   :  { %1384 = vpow2.f32 %v1295_v53 }
 0x2f1   :  { %1386 = vpow2.f32 %v1305_v54 }
 0x2f3   :  { %v218_v50 = vpop.f32.mrf.mxu2 }
 0x2f4   :  { %v1381_v51 = vpop.eup %1380 }
 0x2f5   :  { %244 = vrot.lane.b32.xlu2 %v1381_v51, %s1528_s1  ;;  %v1383_v52 = vpop.eup %1382 }
 0x2f6   :  { %v1385_v55 = vpop.eup %1384 }
 0x2f7   :  { %v225_v56 = vadd.f32 1.0, %v1385_v55  ;;  %v1387_v57 = vpop.eup %1386 }
 0x2f8   :  { %v295_v58 = vadd.f32 1.0, %v1387_v57 }
 0x2f9   :  { %1388 = vrcp.f32 %v225_v56  ;;  %v237_v4 = vand.u32 2147483648, %v225_v56  ;;  %vm231_vm8 = vweird.f32 %v225_v56  ;;  %v235_v5 = vand.u32 2147483647, %v225_v56 }
 0x2fa   :  { %1390 = vrcp.f32 %v295_v58  ;;  %v307_v13 = vand.u32 2147483648, %v295_v58  ;;  %vm301_vm12 = vweird.f32 %v295_v58  ;;  %v305_v14 = vand.u32 2147483647, %v295_v58 }
 0x2fb   :  { %v238_v8 = vor.u32 1.1754944e-38, %v237_v4  ;;  %vm236_vm10 = vcmp.eq.f32.partialorder %v235_v5, 8.507059e+37 }
 0x2fc   :  { %v308_v16 = vor.u32 1.1754944e-38, %v307_v13  ;;  %vm306_vm14 = vcmp.eq.f32.partialorder %v305_v14, 8.507059e+37 }
 0x2fd   :  { %314 = vrot.lane.b32.xlu2 %v1383_v52, %s1528_s1 }
 0x2ff   :  { %v1389_v59 = vpop.eup %1388 }
 0x300   :  { %v227_v60 = vmul.f32 %v1389_v59, %v225_v56  ;;  %v1391_v62 = vpop.eup %1390  ;;  %vm232_vm7 = vweird.f32 %v1389_v59 }
 0x301   :  { %v297_v0 = vmul.f32 %v1391_v62, %v295_v58  ;;  %vm233_vm9 = vmor %vm231_vm8, %vm232_vm7  ;;  %vm302_vm11 = vweird.f32 %v1391_v62 }
 0x302   :  { %v228_v61 = vsub.f32 1.0, %v227_v60  ;;  %vm303_vm13 = vmor %vm301_vm12, %vm302_vm11 }
 0x303   :  { %v298_v2 = vsub.f32 1.0, %v297_v0 }
 0x304   :  { %v229_v63 = vmul.f32 %v1389_v59, %v228_v61 }
 0x305   :  { %v299_v7 = vmul.f32 %v1391_v62, %v298_v2 }
 0x306   :  { %v230_v1 = vadd.f32 %v1389_v59, %v229_v63 }
 0x307   :  { %v300_v12 = vadd.f32 %v1391_v62, %v299_v7 }
 0x308   :  { %v234_v6 = vsel %vm233_vm9, %v1389_v59, %v230_v1 }
 0x309   :  { %v239_v10 = vsel %vm236_vm10, %v238_v8, %v234_v6  ;;  %v304_v15 = vsel %vm303_vm13, %v1391_v62, %v300_v12 }
 0x30a   :  { %v309_v17 = vsel %vm306_vm14, %v308_v16, %v304_v15  ;;  %v242_v20 = vmul.f32 0.0, %v239_v10 }
 0x30b   :  { %v312_v23 = vmul.f32 %v309_v17, %v1601_v24  ;;  %v1680_v24 = vld [vmem:[%s1894_s4 + $0x8] sm:$0xff] }
 0x30c   :  { %284 = vmatpush.bf16.msra.mxu3 %v1680_v24 }
 0x310   :  { %285 = vmatpush.bf16.msra.mxu3 %v1689_v35 }
 0x314   :  { %414 = vmatpush.bf16.msrb.mxu3 %v1680_v24 }
 0x318   :  { %415 = vmatpush.bf16.msrb.mxu3 %v1689_v35 }
 0x34f   :  { %v245_v9 = vpop.permute.xlu2 %244 }
 0x350   :  { %v247_v11 = vmul.f32 %v245_v9, %v239_v10 }
 0x352   :  { %249 = vrot.lane.b32.xlu0 %v247_v11, %s1528_s1 }
 0x357   :  { %v315_v18 = vpop.permute.xlu2 %314 }
 0x358   :  { %v317_v19 = vmul.f32 %v315_v18, %v309_v17 }
 0x35a   :  { %319 = vrot.lane.b32.xlu1 %v317_v19, %s1528_s1 }
 0x3c4   :  { %v250_v21 = vpop.permute.xlu0 %249 }
 0x3c5   :  { %v1667_v22 = vadd.f32 %v250_v21, %v242_v20 }
 0x3c7   :  { %1392 = vtanh.f32 %v1667_v22 }
 0x3cc   :  { %v320_v25 = vpop.permute.xlu1 %319 }
 0x3cd   :  { %v1393_v26 = vpop.eup %1392  ;;  %v1671_v27 = vadd.f32 %v320_v25, %v312_v23 }
 0x3ce   :  { %255 = vrot.lane.b32.xlu2 %v1393_v26, %s1528_s1 }
 0x3cf   :  { %1394 = vtanh.f32 %v1671_v27 }
 0x3d5   :  { %v1395_v28 = vpop.eup %1394 }
 0x3d6   :  { %325 = vrot.lane.b32.xlu0 %v1395_v28, %s1528_s1 }
 0x428   :  { %v256_v30 = vpop.permute.xlu2 %255 }
 0x429   :  { %v258_v31 = vmul.f32 %v256_v30, %v239_v10 }
 0x42b   :  { %v259_v32 = vpack.c.bf16 %v258_v31, %v258_v31 }
 0x42d   :  { %261 = vrot.lane.b32.xlu1 %v259_v32, %s1529_s3 }
 0x448   :  { %v326_v38 = vpop.permute.xlu0 %325 }
 0x449   :  { %v328_v39 = vmul.f32 %v326_v38, %v309_v17 }
 0x44b   :  { %v329_v40 = vpack.c.bf16 %v328_v39, %v328_v39 }
 0x44d   :  { %331 = vrot.lane.b32.xlu2 %v329_v40, %s1529_s3 }
 0x49f   :  { %v262_v41 = vpop.permute.xlu1 %261 }
 0x4a0   :  { %1304 = vmatmul.msk.bf16.vlgmr.msra.gmra.mxu3 %vm190_vm6, %v262_v41 }
 0x4a1   :  { %544 = vmatpush.bf16.msra.mxu3 %v1680_v24 }
 0x4a5   :  { %545 = vmatpush.bf16.msra.mxu3 %v1689_v35 }
 0x4a7   :  { %v332_v42 = vpop.permute.xlu2 %331 }
 0x4a8   :  { %1306 = vmatmul.msk.bf16.vlgmr.msrb.gmra.mxu1 %vm190_vm6, %v332_v42  ;;  %1307 = vmatmul.msk.bf16.vlgmr.msrb.gmra.mxu2 %vm190_vm6, %v332_v42 }
 0x4a9   :  { %615 = vmatpush.bf16.msrb.mxu2 %v1625_v33  ;;  %602 = vmatpush.bf16.msrb.mxu1 %v1614_v29 }
 0x4ad   :  { %616 = vmatpush.bf16.msrb.mxu2 %v1638_v37  ;;  %603 = vmatpush.bf16.msrb.mxu1 %v1634_v36 }
 0x523   :  { %v287_v46 = vpop.f32.mrf.mxu3 }
 0x525   :  { %v345_v47 = vpop.f32.mrf.mxu1 }
 0x526   :  { %v421_v48 = vadd.f32 %v345_v47, %v114_v45  ;;  %v115_v47 = vpop.f32.mrf.mxu0 }
 0x528   :  { %1396 = vtanh.f32 %v421_v48  ;;  %v1310_v57 = vmul.f32 -1.442695, %v421_v48  ;;  %v116_v48 = vadd.f32 %v1596_v3, %v115_v47 }
 0x52b   :  { %v289_v49 = vpop.f32.mrf.mxu3  ;;  %v358_v50 = vpop.f32.mrf.mxu2 }
 0x52c   :  { %v362_v51 = vadd.f32 %v358_v50, %v287_v46 }
 0x52d   :  { %v347_v52 = vpop.f32.mrf.mxu1 }
 0x52e   :  { %v1397_v53 = vpop.eup %1396  ;;  %v363_v54 = vadd.f32 %v1659_v43, %v362_v51 }
 0x52f   :  { %444 = vrot.lane.b32.xlu1 %v1397_v53, %s1528_s1 }
 0x530   :  { %1398 = vtanh.f32 %v363_v54  ;;  %v1308_v58 = vmul.f32 -1.442695, %v363_v54 }
 0x531   :  { %1400 = vpow2.f32 %v1310_v57 }
 0x532   :  { %1402 = vpow2.f32 %v1308_v58 }
 0x533   :  { %v360_v55 = vpop.f32.mrf.mxu2 }
 0x536   :  { %v1399_v56 = vpop.eup %1398 }
 0x537   :  { %386 = vrot.lane.b32.xlu0 %v1399_v56, %s1528_s1  ;;  %v1401_v59 = vpop.eup %1400 }
 0x538   :  { %v425_v60 = vadd.f32 1.0, %v1401_v59  ;;  %v1403_v61 = vpop.eup %1402 }
 0x539   :  { %v367_v62 = vadd.f32 1.0, %v1403_v61 }
 0x53a   :  { %1404 = vrcp.f32 %v425_v60  ;;  %v437_v8 = vand.u32 2147483648, %v425_v60  ;;  %vm431_vm0 = vweird.f32 %v425_v60  ;;  %v435_v9 = vand.u32 2147483647, %v425_v60 }
 0x53b   :  { %1406 = vrcp.f32 %v367_v62  ;;  %v379_v17 = vand.u32 2147483648, %v367_v62  ;;  %vm373_vm5 = vweird.f32 %v367_v62  ;;  %v377_v18 = vand.u32 2147483647, %v367_v62 }
 0x53c   :  { %v438_v12 = vor.u32 1.1754944e-38, %v437_v8  ;;  %vm436_vm3 = vcmp.eq.f32.partialorder %v435_v9, 8.507059e+37 }
 0x53d   :  { %v380_v20 = vor.u32 1.1754944e-38, %v379_v17  ;;  %vm378_vm8 = vcmp.eq.f32.partialorder %v377_v18, 8.507059e+37 }
 0x540   :  { %v1405_v63 = vpop.eup %1404 }
 0x541   :  { %v427_v0 = vmul.f32 %v1405_v63, %v425_v60  ;;  %v1407_v2 = vpop.eup %1406  ;;  %vm432_vm15 = vweird.f32 %v1405_v63 }
 0x542   :  { %v369_v5 = vmul.f32 %v1407_v2, %v367_v62  ;;  %vm433_vm2 = vmor %vm431_vm0, %vm432_vm15  ;;  %vm374_vm4 = vweird.f32 %v1407_v2 }
 0x543   :  { %v428_v1 = vsub.f32 1.0, %v427_v0  ;;  %vm375_vm7 = vmor %vm373_vm5, %vm374_vm4 }
 0x544   :  { %v370_v7 = vsub.f32 1.0, %v369_v5 }
 0x545   :  { %v429_v4 = vmul.f32 %v1405_v63, %v428_v1 }
 0x546   :  { %v371_v11 = vmul.f32 %v1407_v2, %v370_v7 }
 0x547   :  { %v430_v6 = vadd.f32 %v1405_v63, %v429_v4 }
 0x548   :  { %v372_v16 = vadd.f32 %v1407_v2, %v371_v11 }
 0x549   :  { %v434_v10 = vsel %vm433_vm2, %v1405_v63, %v430_v6 }
 0x54a   :  { %v439_v14 = vsel %vm436_vm3, %v438_v12, %v434_v10  ;;  %v376_v19 = vsel %vm375_vm7, %v1407_v2, %v372_v16 }
 0x54b   :  { %v381_v23 = vsel %vm378_vm8, %v380_v20, %v376_v19  ;;  %v442_v32 = vmul.f32 %v439_v14, %v1671_v27 }
 0x54c   :  { %v384_v26 = vmul.f32 %v381_v23, %v1667_v22 }
 0x5a1   :  { %v445_v13 = vpop.permute.xlu1 %444 }
 0x5a2   :  { %v447_v15 = vmul.f32 %v445_v13, %v439_v14 }
 0x5a4   :  { %449 = vrot.lane.b32.xlu0 %v447_v15, %s1528_s1 }
 0x5a9   :  { %v387_v21 = vpop.permute.xlu0 %386 }
 0x5aa   :  { %v389_v25 = vmul.f32 %v387_v21, %v381_v23 }
 0x5ac   :  { %391 = vrot.lane.b32.xlu2 %v389_v25, %s1528_s1 }
 0x606   :  { %v392_v28 = vpop.permute.xlu2 %391 }
 0x607   :  { %v1712_v30 = vadd.f32 %v392_v28, %v384_v26 }
 0x609   :  { %1408 = vtanh.f32 %v1712_v30 }
 0x60f   :  { %v1409_v31 = vpop.eup %1408 }
 0x610   :  { %397 = vrot.lane.b32.xlu1 %v1409_v31, %s1528_s1 }
 0x616   :  { %v450_v34 = vpop.permute.xlu0 %449 }
 0x617   :  { %v1717_v38 = vadd.f32 %v450_v34, %v442_v32 }
 0x619   :  { %1410 = vtanh.f32 %v1717_v38 }
 0x61f   :  { %v1411_v39 = vpop.eup %1410 }
 0x620   :  { %455 = vrot.lane.b32.xlu2 %v1411_v39, %s1528_s1 }
 0x67a   :  { %v456_v40 = vpop.permute.xlu2 %455 }
 0x67b   :  { %v458_v22 = vmul.f32 %v456_v40, %v439_v14 }
 0x67d   :  { %v459_v41 = vpack.c.bf16 %v458_v22, %v458_v22 }
 0x67f   :  { %461 = vrot.lane.b32.xlu1 %v459_v41, %s1529_s3 }
 0x682   :  { %v398_v42 = vpop.permute.xlu1 %397 }
 0x683   :  { %v400_v44 = vmul.f32 %v398_v42, %v381_v23 }
 0x685   :  { %v401_v45 = vpack.c.bf16 %v400_v44, %v400_v44 }
 0x687   :  { %403 = vrot.lane.b32.xlu0 %v401_v45, %s1529_s3 }
 0x6f1   :  { %v462_v46 = vpop.permute.xlu1 %461 }
 0x6f2   :  { %1311 = vmatmul.msk.bf16.vlgmr.msra.gmra.mxu1 %vm190_vm6, %v462_v46  ;;  %1312 = vmatmul.msk.bf16.vlgmr.msra.gmra.mxu2 %vm190_vm6, %v462_v46 }
 0x6f3   :  { %745 = vmatpush.bf16.msra.mxu1 %v1625_v33  ;;  %804 = vmatpush.bf16.msra.mxu2 %v1680_v24 }
 0x6f7   :  { %746 = vmatpush.bf16.msra.mxu1 %v1638_v37  ;;  %805 = vmatpush.bf16.msra.mxu2 %v1689_v35 }
 0x6f9   :  { %v404_v27 = vpop.permute.xlu0 %403 }
 0x6fa   :  { %1309 = vmatmul.msk.bf16.vlgmr.msrb.gmra.mxu3 %vm190_vm6, %v404_v27 }
 0x6fb   :  { %674 = vmatpush.bf16.msrb.mxu3 %v1680_v24 }
 0x6ff   :  { %675 = vmatpush.bf16.msrb.mxu3 %v1689_v35 }
 0x76f   :  { %v475_v49 = vpop.f32.mrf.mxu1 }
 0x770   :  { %v551_v50 = vadd.f32 %v475_v49, %v116_v48 }
 0x772   :  { %1412 = vtanh.f32 %v551_v50  ;;  %v1315_v61 = vmul.f32 -1.442695, %v551_v50 }
 0x775   :  { %v488_v51 = vpop.f32.mrf.mxu2 }
 0x777   :  { %v477_v52 = vpop.f32.mrf.mxu1 }
 0x778   :  { %v1413_v53 = vpop.eup %1412 }
 0x779   :  { %574 = vrot.lane.b32.xlu0 %v1413_v53, %s1528_s1 }
 0x77d   :  { %v417_v54 = vpop.f32.mrf.mxu3  ;;  %v490_v55 = vpop.f32.mrf.mxu2 }
 0x77e   :  { %v492_v56 = vadd.f32 %v488_v51, %v417_v54 }
 0x780   :  { %v493_v57 = vadd.f32 %v1659_v43, %v492_v56 }
 0x782   :  { %1414 = vtanh.f32 %v493_v57  ;;  %v1313_v60 = vmul.f32 -1.442695, %v493_v57 }
 0x784   :  { %1416 = vpow2.f32 %v1313_v60 }
 0x785   :  { %v419_v58 = vpop.f32.mrf.mxu3  ;;  %1418 = vpow2.f32 %v1315_v61 }
 0x788   :  { %v1415_v59 = vpop.eup %1414 }
 0x789   :  { %516 = vrot.lane.b32.xlu2 %v1415_v59, %s1528_s1 }
 0x78a   :  { %v1417_v62 = vpop.eup %1416 }
 0x78b   :  { %v497_v63 = vadd.f32 1.0, %v1417_v62  ;;  %v1419_v0 = vpop.eup %1418 }
 0x78c   :  { %v555_v1 = vadd.f32 1.0, %v1419_v0 }
 0x78d   :  { %1420 = vrcp.f32 %v497_v63  ;;  %v509_v11 = vand.u32 2147483648, %v497_v63  ;;  %vm503_vm10 = vweird.f32 %v497_v63  ;;  %v507_v12 = vand.u32 2147483647, %v497_v63 }
 0x78e   :  { %1422 = vrcp.f32 %v555_v1  ;;  %v567_v20 = vand.u32 2147483648, %v555_v1  ;;  %vm561_vm14 = vweird.f32 %v555_v1  ;;  %v565_v21 = vand.u32 2147483647, %v555_v1 }
 0x78f   :  { %v510_v15 = vor.u32 1.1754944e-38, %v509_v11  ;;  %vm508_vm12 = vcmp.eq.f32.partialorder %v507_v12, 8.507059e+37 }
 0x790   :  { %v568_v25 = vor.u32 1.1754944e-38, %v567_v20  ;;  %vm566_vm0 = vcmp.eq.f32.partialorder %v565_v21, 8.507059e+37 }
 0x793   :  { %v1421_v2 = vpop.eup %1420 }
 0x794   :  { %v499_v4 = vmul.f32 %v1421_v2, %v497_v63  ;;  %v1423_v6 = vpop.eup %1422  ;;  %vm504_vm9 = vweird.f32 %v1421_v2 }
 0x795   :  { %v557_v8 = vmul.f32 %v1423_v6, %v555_v1  ;;  %vm505_vm11 = vmor %vm503_vm10, %vm504_vm9  ;;  %vm562_vm13 = vweird.f32 %v1423_v6 }
 0x796   :  { %v500_v5 = vsub.f32 1.0, %v499_v4  ;;  %vm563_vm15 = vmor %vm561_vm14, %vm562_vm13 }
 0x797   :  { %v558_v10 = vsub.f32 1.0, %v557_v8 }
 0x798   :  { %v501_v7 = vmul.f32 %v1421_v2, %v500_v5 }
 0x799   :  { %v559_v14 = vmul.f32 %v1423_v6, %v558_v10 }
 0x79a   :  { %v502_v9 = vadd.f32 %v1421_v2, %v501_v7 }
 0x79b   :  { %v560_v19 = vadd.f32 %v1423_v6, %v559_v14 }
 0x79c   :  { %v506_v13 = vsel %vm505_vm11, %v1421_v2, %v502_v9 }
 0x79d   :  { %v511_v17 = vsel %vm508_vm12, %v510_v15, %v506_v13  ;;  %v564_v23 = vsel %vm563_vm15, %v1423_v6, %v560_v19 }
 0x79e   :  { %v569_v28 = vsel %vm566_vm0, %v568_v25, %v564_v23  ;;  %v514_v22 = vmul.f32 %v511_v17, %v1712_v30  ;;  %v1360_v30 = vld [vmem:[%s1890_s0 + $0x10] sm:$0xff] }
 0x79f   :  { %v572_v32 = vmul.f32 %v569_v28, %v1717_v38  ;;  %1274 = vmatmul.msk.bf16.gmra.mxu0 %vm82_vm1, %v1360_v30 }
 0x7e3   :  { %v517_v16 = vpop.permute.xlu2 %516 }
 0x7e4   :  { %v519_v18 = vmul.f32 %v517_v16, %v511_v17 }
 0x7e6   :  { %521 = vrot.lane.b32.xlu1 %v519_v18, %s1528_s1 }
 0x7eb   :  { %v575_v26 = vpop.permute.xlu0 %574 }
 0x7ec   :  { %v577_v31 = vmul.f32 %v575_v26, %v569_v28 }
 0x7ee   :  { %579 = vrot.lane.b32.xlu2 %v577_v31, %s1528_s1 }
 0x81c   :  { %v118_v51 = vpop.f32.mrf.mxu0 }
 0x81d   :  { %v119_v52 = vadd.f32 %v1596_v3, %v118_v51 }
 0x848   :  { %v580_v34 = vpop.permute.xlu2 %579 }
 0x849   :  { %v1739_v39 = vadd.f32 %v580_v34, %v572_v32 }
 0x84b   :  { %1424 = vtanh.f32 %v1739_v39 }
 0x851   :  { %v1425_v40 = vpop.eup %1424 }
 0x852   :  { %585 = vrot.lane.b32.xlu1 %v1425_v40, %s1528_s1 }
 0x858   :  { %v522_v41 = vpop.permute.xlu1 %521 }
 0x859   :  { %v1744_v42 = vadd.f32 %v522_v41, %v514_v22 }
 0x85b   :  { %1426 = vtanh.f32 %v1744_v42 }
 0x861   :  { %v1427_v44 = vpop.eup %1426 }
 0x862   :  { %527 = vrot.lane.b32.xlu0 %v1427_v44, %s1528_s1 }
 0x8c4   :  { %v586_v45 = vpop.permute.xlu1 %585 }
 0x8c5   :  { %v588_v38 = vmul.f32 %v586_v45, %v569_v28 }
 0x8c7   :  { %v589_v46 = vpack.c.bf16 %v588_v38, %v588_v38 }
 0x8c9   :  { %591 = vrot.lane.b32.xlu0 %v589_v46, %s1529_s3 }
 0x8d4   :  { %v528_v27 = vpop.permute.xlu0 %527 }
 0x8d5   :  { %v530_v47 = vmul.f32 %v528_v27, %v511_v17 }
 0x8d7   :  { %v531_v48 = vpack.c.bf16 %v530_v47, %v530_v47 }
 0x8d9   :  { %533 = vrot.lane.b32.xlu2 %v531_v48, %s1529_s3 }
 0x933   :  { %v534_v49 = vpop.permute.xlu2 %533 }
 0x934   :  { %1314 = vmatmul.msk.bf16.vlgmr.msra.gmra.mxu3 %vm190_vm6, %v534_v49 }
 0x935   :  { %862 = vmatpush.bf16.msra.mxu3 %v1614_v29 }
 0x939   :  { %863 = vmatpush.bf16.msra.mxu3 %v1634_v36 }
 0x93b   :  { %v592_v50 = vpop.permute.xlu0 %591 }
 0x93c   :  { %1316 = vmatmul.msk.bf16.vlgmr.msrb.gmra.mxu1 %vm190_vm6, %v592_v50  ;;  %1317 = vmatmul.msk.bf16.vlgmr.msrb.gmra.mxu2 %vm190_vm6, %v592_v50 }
 0x93d   :  { %992 = vmatpush.bf16.msrb.mxu2 %v1614_v29  ;;  %934 = vmatpush.bf16.msrb.mxu1 %v1680_v24 }
 0x941   :  { %993 = vmatpush.bf16.msrb.mxu2 %v1634_v36  ;;  %935 = vmatpush.bf16.msrb.mxu1 %v1689_v35 }
 0x9b7   :  { %v547_v53 = vpop.f32.mrf.mxu3 }
 0x9b9   :  { %v605_v54 = vpop.f32.mrf.mxu1 }
 0x9ba   :  { %v681_v55 = vadd.f32 %v605_v54, %v119_v52 }
 0x9bc   :  { %1428 = vtanh.f32 %v681_v55  ;;  %v1320_v62 = vmul.f32 -1.442695, %v681_v55 }
 0x9bf   :  { %v549_v56 = vpop.f32.mrf.mxu3  ;;  %v618_v57 = vpop.f32.mrf.mxu2 }
 0x9c0   :  { %v622_v58 = vadd.f32 %v618_v57, %v547_v53  ;;  %v120_v53 = vpop.f32.mrf.mxu0 }
 0x9c1   :  { %v607_v59 = vpop.f32.mrf.mxu1  ;;  %v121_v56 = vadd.f32 %v1596_v3, %v120_v53 }
 0x9c2   :  { %v1429_v60 = vpop.eup %1428  ;;  %v623_v29 = vadd.f32 %v1659_v43, %v622_v58 }
 0x9c3   :  { %704 = vrot.lane.b32.xlu2 %v1429_v60, %s1528_s1 }
 0x9c4   :  { %1430 = vtanh.f32 %v623_v29  ;;  %v1318_v5 = vmul.f32 -1.442695, %v623_v29 }
 0x9c5   :  { %1432 = vpow2.f32 %v1320_v62 }
 0x9c7   :  { %v620_v36 = vpop.f32.mrf.mxu2 }
 0x9ca   :  { %v1431_v61 = vpop.eup %1430 }
 0x9cb   :  { %646 = vrot.lane.b32.xlu1 %v1431_v61, %s1528_s1  ;;  %v1433_v63 = vpop.eup %1432 }
 0x9cc   :  { %v685_v0 = vadd.f32 1.0, %v1433_v63 }
 0x9ce   :  { %1434 = vrcp.f32 %v685_v0  ;;  %v697_v8 = vand.u32 2147483648, %v685_v0  ;;  %vm691_vm3 = vweird.f32 %v685_v0  ;;  %v695_v9 = vand.u32 2147483647, %v685_v0 }
 0x9cf   :  { %1436 = vpow2.f32 %v1318_v5 }
 0x9d0   :  { %v698_v12 = vor.u32 1.1754944e-38, %v697_v8  ;;  %vm696_vm5 = vcmp.eq.f32.partialorder %v695_v9, 8.507059e+37 }
 0x9d4   :  { %v1435_v1 = vpop.eup %1434 }
 0x9d5   :  { %v687_v2 = vmul.f32 %v1435_v1, %v685_v0  ;;  %vm692_vm2 = vweird.f32 %v1435_v1  ;;  %v1437_v10 = vpop.eup %1436 }
 0x9d6   :  { %vm693_vm4 = vmor %vm691_vm3, %vm692_vm2  ;;  %v627_v13 = vadd.f32 1.0, %v1437_v10 }
 0x9d7   :  { %v688_v4 = vsub.f32 1.0, %v687_v2 }
 0x9d8   :  { %1438 = vrcp.f32 %v627_v13  ;;  %v639_v23 = vand.u32 2147483648, %v627_v13  ;;  %vm633_vm8 = vweird.f32 %v627_v13  ;;  %v637_v25 = vand.u32 2147483647, %v627_v13 }
 0x9d9   :  { %v689_v6 = vmul.f32 %v1435_v1, %v688_v4 }
 0x9da   :  { %v640_v28 = vor.u32 1.1754944e-38, %v639_v23  ;;  %vm638_vm10 = vcmp.eq.f32.partialorder %v637_v25, 8.507059e+37 }
 0x9db   :  { %v690_v7 = vadd.f32 %v1435_v1, %v689_v6 }
 0x9dd   :  { %v694_v11 = vsel %vm693_vm4, %v1435_v1, %v690_v7 }
 0x9de   :  { %v699_v15 = vsel %vm696_vm5, %v698_v12, %v694_v11  ;;  %v1439_v17 = vpop.eup %1438 }
 0x9df   :  { %v629_v18 = vmul.f32 %v1439_v17, %v627_v13  ;;  %vm634_vm7 = vweird.f32 %v1439_v17  ;;  %v702_v40 = vmul.f32 %v699_v15, %v1739_v39  ;;  %v1361_v39 = vld [vmem:[%s1890_s0 + $0x18] sm:$0xff] }
 0x9e0   :  { %vm635_vm9 = vmor %vm633_vm8, %vm634_vm7  ;;  %1275 = vmatmul.msk.bf16.gmra.mxu0 %vm82_vm1, %v1361_v39 }
 0x9e1   :  { %v630_v19 = vsub.f32 1.0, %v629_v18 }
 0x9e3   :  { %v631_v20 = vmul.f32 %v1439_v17, %v630_v19 }
 0x9e5   :  { %v632_v21 = vadd.f32 %v1439_v17, %v631_v20 }
 0x9e7   :  { %v636_v26 = vsel %vm635_vm9, %v1439_v17, %v632_v21 }
 0x9e8   :  { %v641_v32 = vsel %vm638_vm10, %v640_v28, %v636_v26 }
 0x9e9   :  { %v644_v45 = vmul.f32 %v641_v32, %v1744_v42 }
 0xa1d   :  { %v705_v14 = vpop.permute.xlu2 %704 }
 0xa1e   :  { %v707_v16 = vmul.f32 %v705_v14, %v699_v15 }
 0xa20   :  { %709 = vrot.lane.b32.xlu1 %v707_v16, %s1528_s1 }
 0xa3d   :  { %v647_v31 = vpop.permute.xlu1 %646 }
 0xa3e   :  { %v649_v34 = vmul.f32 %v647_v31, %v641_v32 }
 0xa40   :  { %651 = vrot.lane.b32.xlu0 %v649_v34, %s1528_s1 }
 0xa5d   :  { %v1794_v54 = vpop.f32.mrf.mxu0 }
 0xa65   :  { %v1796_v55 = vpop.f32.mrf.mxu0 }
 0xa92   :  { %v710_v22 = vpop.permute.xlu1 %709 }
 0xa93   :  { %v1770_v41 = vadd.f32 %v710_v22, %v702_v40 }
 0xa95   :  { %1440 = vtanh.f32 %v1770_v41 }
 0xa9b   :  { %v1441_v44 = vpop.eup %1440 }
 0xa9c   :  { %715 = vrot.lane.b32.xlu0 %v1441_v44, %s1528_s1 }
 0xab2   :  { %v652_v38 = vpop.permute.xlu0 %651 }
 0xab3   :  { %v1775_v46 = vadd.f32 %v652_v38, %v644_v45 }
 0xab5   :  { %1442 = vtanh.f32 %v1775_v46 }
 0xabb   :  { %v1443_v27 = vpop.eup %1442 }
 0xabc   :  { %657 = vrot.lane.b32.xlu2 %v1443_v27, %s1528_s1 }
 0xb0e   :  { %v716_v47 = vpop.permute.xlu0 %715 }
 0xb0f   :  { %v718_v48 = vmul.f32 %v716_v47, %v699_v15 }
 0xb11   :  { %v719_v30 = vpack.c.bf16 %v718_v48, %v718_v48 }
 0xb13   :  { %721 = vrot.lane.b32.xlu2 %v719_v30, %s1529_s3 }
 0xb16   :  { %v658_v42 = vpop.permute.xlu2 %657 }
 0xb17   :  { %v660_v49 = vmul.f32 %v658_v42, %v641_v32 }
 0xb19   :  { %v661_v50 = vpack.c.bf16 %v660_v49, %v660_v49 }
 0xb1b   :  { %663 = vrot.lane.b32.xlu1 %v661_v50, %s1529_s3 }
 0xb6d   :  { %v722_v51 = vpop.permute.xlu2 %721 }
 0xb6e   :  { %1321 = vmatmul.msk.bf16.vlgmr.msrb.gmra.mxu0 %vm190_vm6, %v722_v51  ;;  %1322 = vmatmul.msk.bf16.vlgmr.msra.gmra.mxu1 %vm190_vm6, %v722_v51 }
 0xb6f   :  { %1122 = vmatpush.bf16.msra.mxu1 %v1625_v33  ;;  %1064 = vmatpush.bf16.msrb.mxu0 %v1680_v24 }
 0xb73   :  { %1123 = vmatpush.bf16.msra.mxu1 %v1638_v37  ;;  %1065 = vmatpush.bf16.msrb.mxu0 %v1689_v35 }
 0xb8d   :  { %v664_v52 = vpop.permute.xlu1 %663 }
 0xb8e   :  { %1319 = vmatmul.msk.bf16.vlgmr.msrb.gmra.mxu3 %vm190_vm6, %v664_v52  ;;  %v1822_v52 = vld [vmem:[%s1892_s2] ss:$0 sm:$0xff] }
 0xb8f   :  { %1005 = vmatpush.bf16.msrb.mxu3 %v1625_v33  ;;  %v124_v53 = vadd.f32 %v1822_v52, %v1794_v54 }
 0xb93   :  { %1006 = vmatpush.bf16.msrb.mxu3 %v1638_v37 }
 0xbeb   :  { %v735_v57 = vpop.f32.mrf.mxu0  ;;  %v748_v24 = vpop.f32.mrf.mxu1 }
 0xbec   :  { %v811_v58 = vadd.f32 %v735_v57, %v121_v56 }
 0xbee   :  { %1444 = vtanh.f32 %v811_v58  ;;  %v1325_v62 = vmul.f32 -1.442695, %v811_v58 }
 0xbf3   :  { %v737_v59 = vpop.f32.mrf.mxu0  ;;  %v750_v35 = vpop.f32.mrf.mxu1 }
 0xbf4   :  { %v1445_v60 = vpop.eup %1444 }
 0xbf5   :  { %834 = vrot.lane.b32.xlu0 %v1445_v60, %s1528_s1 }
 0xc11   :  { %v677_v29 = vpop.f32.mrf.mxu3 }
 0xc12   :  { %v752_v33 = vadd.f32 %v748_v24, %v677_v29 }
 0xc14   :  { %v753_v37 = vadd.f32 %v1659_v43, %v752_v33 }
 0xc16   :  { %1446 = vtanh.f32 %v753_v37  ;;  %v1323_v7 = vmul.f32 -1.442695, %v753_v37 }
 0xc17   :  { %1448 = vpow2.f32 %v1325_v62 }
 0xc19   :  { %v679_v36 = vpop.f32.mrf.mxu3 }
 0xc1c   :  { %v1447_v61 = vpop.eup %1446 }
 0xc1d   :  { %776 = vrot.lane.b32.xlu1 %v1447_v61, %s1528_s1  ;;  %v1449_v3 = vpop.eup %1448 }
 0xc1e   :  { %v815_v63 = vadd.f32 1.0, %v1449_v3 }
 0xc20   :  { %1450 = vrcp.f32 %v815_v63  ;;  %v827_v6 = vand.u32 2147483648, %v815_v63  ;;  %vm821_vm11 = vweird.f32 %v815_v63  ;;  %v825_v8 = vand.u32 2147483647, %v815_v63 }
 0xc21   :  { %1452 = vpow2.f32 %v1323_v7 }
 0xc22   :  { %v828_v10 = vor.u32 1.1754944e-38, %v827_v6  ;;  %vm826_vm13 = vcmp.eq.f32.partialorder %v825_v8, 8.507059e+37 }
 0xc26   :  { %v1451_v0 = vpop.eup %1450 }
 0xc27   :  { %v817_v1 = vmul.f32 %v1451_v0, %v815_v63  ;;  %vm822_vm1 = vweird.f32 %v1451_v0  ;;  %v1453_v14 = vpop.eup %1452 }
 0xc28   :  { %vm823_vm12 = vmor %vm821_vm11, %vm822_vm1  ;;  %v757_v15 = vadd.f32 1.0, %v1453_v14 }
 0xc29   :  { %v818_v2 = vsub.f32 1.0, %v817_v1 }
 0xc2a   :  { %1454 = vrcp.f32 %v757_v15  ;;  %v769_v21 = vand.u32 2147483648, %v757_v15  ;;  %vm763_vm15 = vweird.f32 %v757_v15  ;;  %v767_v23 = vand.u32 2147483647, %v757_v15 }
 0xc2b   :  { %v819_v4 = vmul.f32 %v1451_v0, %v818_v2 }
 0xc2c   :  { %v770_v26 = vor.u32 1.1754944e-38, %v769_v21  ;;  %vm768_vm2 = vcmp.eq.f32.partialorder %v767_v23, 8.507059e+37 }
 0xc2d   :  { %v820_v5 = vadd.f32 %v1451_v0, %v819_v4 }
 0xc2f   :  { %v824_v9 = vsel %vm823_vm12, %v1451_v0, %v820_v5 }
 0xc30   :  { %v829_v12 = vsel %vm826_vm13, %v828_v10, %v824_v9  ;;  %v1455_v16 = vpop.eup %1454 }
 0xc31   :  { %v759_v17 = vmul.f32 %v1455_v16, %v757_v15  ;;  %vm764_vm14 = vweird.f32 %v1455_v16  ;;  %v832_v34 = vmul.f32 %v829_v12, %v1770_v41 }
 0xc32   :  { %vm765_vm0 = vmor %vm763_vm15, %vm764_vm14 }
 0xc33   :  { %v760_v18 = vsub.f32 1.0, %v759_v17 }
 0xc35   :  { %v761_v19 = vmul.f32 %v1455_v16, %v760_v18 }
 0xc37   :  { %v762_v20 = vadd.f32 %v1455_v16, %v761_v19 }
 0xc39   :  { %v766_v25 = vsel %vm765_vm0, %v1455_v16, %v762_v20 }
 0xc3a   :  { %v771_v31 = vsel %vm768_vm2, %v770_v26, %v766_v25 }
 0xc3b   :  { %v774_v45 = vmul.f32 %v771_v31, %v1775_v46 }
 0xc67   :  { %v835_v11 = vpop.permute.xlu0 %834 }
 0xc68   :  { %v837_v13 = vmul.f32 %v835_v11, %v829_v12 }
 0xc6a   :  { %839 = vrot.lane.b32.xlu2 %v837_v13, %s1528_s1 }
 0xc8f   :  { %v777_v28 = vpop.permute.xlu1 %776 }
 0xc90   :  { %v779_v32 = vmul.f32 %v777_v28, %v771_v31 }
 0xc92   :  { %781 = vrot.lane.b32.xlu0 %v779_v32, %s1528_s1 }
 0xcc4   :  { %v840_v40 = vpop.permute.xlu2 %839 }
 0xcc5   :  { %v1805_v22 = vadd.f32 %v840_v40, %v832_v34 }
 0xcc7   :  { %1456 = vtanh.f32 %v1805_v22 }
 0xccd   :  { %v1457_v44 = vpop.eup %1456 }
 0xcce   :  { %845 = vrot.lane.b32.xlu1 %v1457_v44, %s1528_s1 }
 0xd04   :  { %v782_v38 = vpop.permute.xlu0 %781 }
 0xd05   :  { %v1810_v27 = vadd.f32 %v782_v38, %v774_v45 }
 0xd07   :  { %1458 = vtanh.f32 %v1810_v27 }
 0xd0d   :  { %v1459_v39 = vpop.eup %1458 }
 0xd0e   :  { %787 = vrot.lane.b32.xlu2 %v1459_v39, %s1528_s1 }
 0xd40   :  { %v846_v47 = vpop.permute.xlu1 %845 }
 0xd41   :  { %v848_v41 = vmul.f32 %v846_v47, %v829_v12 }
 0xd43   :  { %v849_v48 = vpack.c.bf16 %v848_v41, %v848_v41 }
 0xd45   :  { %851 = vrot.lane.b32.xlu0 %v849_v48, %s1529_s3 }
 0xd68   :  { %v788_v30 = vpop.permute.xlu2 %787 }
 0xd69   :  { %v790_v42 = vmul.f32 %v788_v30, %v771_v31 }
 0xd6b   :  { %v791_v49 = vpack.c.bf16 %v790_v42, %v790_v42  ;;  %v126_v42 = vadd.f32 %v1822_v52, %v1796_v55 }
 0xd6d   :  { %793 = vrot.lane.b32.xlu1 %v791_v49, %s1529_s3 }
 0xdb7   :  { %v852_v50 = vpop.permute.xlu0 %851 }
 0xdb8   :  { %1326 = vmatmul.msk.bf16.vlgmr.msra.gmra.mxu3 %vm190_vm6, %v852_v50  ;;  %1327 = vmatmul.msk.bf16.vlgmr.msra.gmra.mxu0 %vm190_vm6, %v852_v50 }
 0xddf   :  { %v794_v46 = vpop.permute.xlu1 %793 }
 0xde0   :  { %1324 = vmatmul.msk.bf16.vlgmr.msra.gmra.mxu2 %vm190_vm6, %v794_v46 }
 0xe35   :  { %v878_v51 = vpop.f32.mrf.mxu0 }
 0xe3b   :  { %v865_v56 = vpop.f32.mrf.mxu3 }
 0xe3c   :  { %v941_v57 = vadd.f32 %v865_v56, %v124_v53 }
 0xe3d   :  { %v880_v24 = vpop.f32.mrf.mxu0 }
 0xe3e   :  { %1460 = vtanh.f32 %v941_v57  ;;  %v1330_v36 = vmul.f32 -1.442695, %v941_v57 }
 0xe43   :  { %v867_v58 = vpop.f32.mrf.mxu3 }
 0xe44   :  { %v1461_v59 = vpop.eup %1460 }
 0xe45   :  { %964 = vrot.lane.b32.xlu2 %v1461_v59, %s1528_s1  ;;  %v1852_v59 = vld [vmem:[%s1895_s5] ss:$0 sm:$0xff] }
 0xe63   :  { %v807_v35 = vpop.f32.mrf.mxu2 }
 0xe64   :  { %v882_v60 = vadd.f32 %v878_v51, %v807_v35 }
 0xe66   :  { %v883_v29 = vadd.f32 %v1659_v43, %v882_v60 }
 0xe68   :  { %1462 = vtanh.f32 %v883_v29  ;;  %v1328_v9 = vmul.f32 -1.442695, %v883_v29 }
 0xe69   :  { %1464 = vpow2.f32 %v1330_v36 }
 0xe6b   :  { %v809_v33 = vpop.f32.mrf.mxu2 }
 0xe6e   :  { %v1463_v37 = vpop.eup %1462 }
 0xe6f   :  { %906 = vrot.lane.b32.xlu0 %v1463_v37, %s1528_s1  ;;  %v1465_v54 = vpop.eup %1464 }
 0xe70   :  { %v945_v61 = vadd.f32 1.0, %v1465_v54 }
 0xe72   :  { %1466 = vrcp.f32 %v945_v61  ;;  %v957_v2 = vand.u32 2147483648, %v945_v61  ;;  %vm951_vm4 = vweird.f32 %v945_v61  ;;  %v955_v4 = vand.u32 2147483647, %v945_v61 }
 0xe73   :  { %1468 = vpow2.f32 %v1328_v9 }
 0xe74   :  { %v958_v5 = vor.u32 1.1754944e-38, %v957_v2  ;;  %vm956_vm7 = vcmp.eq.f32.partialorder %v955_v4, 8.507059e+37 }
 0xe78   :  { %v1467_v62 = vpop.eup %1466 }
 0xe79   :  { %v947_v3 = vmul.f32 %v1467_v62, %v945_v61  ;;  %vm952_vm3 = vweird.f32 %v1467_v62  ;;  %v1469_v10 = vpop.eup %1468 }
 0xe7a   :  { %vm953_vm5 = vmor %vm951_vm4, %vm952_vm3  ;;  %v887_v11 = vadd.f32 1.0, %v1469_v10 }
 0xe7b   :  { %v948_v63 = vsub.f32 1.0, %v947_v3 }
 0xe7c   :  { %1470 = vrcp.f32 %v887_v11  ;;  %v899_v17 = vand.u32 2147483648, %v887_v11  ;;  %vm893_vm9 = vweird.f32 %v887_v11  ;;  %v897_v18 = vand.u32 2147483647, %v887_v11 }
 0xe7d   :  { %v949_v0 = vmul.f32 %v1467_v62, %v948_v63 }
 0xe7e   :  { %v900_v20 = vor.u32 1.1754944e-38, %v899_v17  ;;  %vm898_vm1 = vcmp.eq.f32.partialorder %v897_v18, 8.507059e+37 }
 0xe7f   :  { %v950_v1 = vadd.f32 %v1467_v62, %v949_v0 }
 0xe81   :  { %v954_v43 = vsel %vm953_vm5, %v1467_v62, %v950_v1 }
 0xe82   :  { %v959_v7 = vsel %vm956_vm7, %v958_v5, %v954_v43  ;;  %v1471_v12 = vpop.eup %1470 }
 0xe83   :  { %v889_v13 = vmul.f32 %v1471_v12, %v887_v11  ;;  %vm894_vm8 = vweird.f32 %v1471_v12  ;;  %v962_v26 = vmul.f32 %v959_v7, %v1805_v22 }
 0xe84   :  { %vm895_vm10 = vmor %vm893_vm9, %vm894_vm8  ;;  %vm1222_vm9 = vcmask 130048  }
 0xe85   :  { %v890_v14 = vsub.f32 1.0, %v889_v13 }
 0xe87   :  { %v891_v15 = vmul.f32 %v1471_v12, %v890_v14 }
 0xe89   :  { %v892_v16 = vadd.f32 %v1471_v12, %v891_v15 }
 0xe8b   :  { %v896_v19 = vsel %vm895_vm10, %v1471_v12, %v892_v16 }
 0xe8c   :  { %v901_v23 = vsel %vm898_vm1, %v900_v20, %v896_v19 }
 0xe8d   :  { %v904_v34 = vmul.f32 %v901_v23, %v1810_v27 }
 0xe9f   :  { %v965_v6 = vpop.permute.xlu2 %964 }
 0xea0   :  { %v967_v8 = vmul.f32 %v965_v6, %v959_v7 }
 0xea2   :  { %969 = vrot.lane.b32.xlu1 %v967_v8, %s1528_s1 }
 0xee1   :  { %v907_v21 = vpop.permute.xlu0 %906 }
 0xee2   :  { %v909_v25 = vmul.f32 %v907_v21, %v901_v23 }
 0xee4   :  { %911 = vrot.lane.b32.xlu2 %v909_v25, %s1528_s1 }
 0xf14   :  { %v970_v28 = vpop.permute.xlu1 %969 }
 0xf15   :  { %v1832_v31 = vadd.f32 %v970_v28, %v962_v26 }
 0xf17   :  { %1472 = vtanh.f32 %v1832_v31 }
 0xf1d   :  { %v1473_v32 = vpop.eup %1472 }
 0xf1e   :  { %975 = vrot.lane.b32.xlu0 %v1473_v32, %s1528_s1 }
 0xf3e   :  { %v912_v40 = vpop.permute.xlu2 %911 }
 0xf3f   :  { %v1837_v44 = vadd.f32 %v912_v40, %v904_v34 }
 0xf41   :  { %1474 = vtanh.f32 %v1837_v44 }
 0xf47   :  { %v1475_v45 = vpop.eup %1474 }
 0xf48   :  { %917 = vrot.lane.b32.xlu1 %v1475_v45, %s1528_s1 }
 0xf90   :  { %v976_v38 = vpop.permute.xlu0 %975 }
 0xf91   :  { %v978_v22 = vmul.f32 %v976_v38, %v959_v7 }
 0xf93   :  { %v979_v39 = vpack.c.bf16 %v978_v22, %v978_v22 }
 0xf95   :  { %981 = vrot.lane.b32.xlu2 %v979_v39, %s1529_s3 }
 0xfba   :  { %v918_v47 = vpop.permute.xlu1 %917 }
 0xfbb   :  { %v920_v41 = vmul.f32 %v918_v47, %v901_v23 }
 0xfbd   :  { %v921_v48 = vpack.c.bf16 %v920_v41, %v920_v41 }
 0xfbf   :  { %923 = vrot.lane.b32.xlu0 %v921_v48, %s1529_s3 }
 0xfef   :  { %v982_v30 = vpop.permute.xlu2 %981 }
 0xff0   :  { %1331 = vmatmul.msk.bf16.vlgmr.msrb.gmra.mxu2 %vm190_vm6, %v982_v30  ;;  %1332 = vmatmul.msk.bf16.vlgmr.msrb.gmra.mxu3 %vm190_vm6, %v982_v30 }
0x1031   :  { %v924_v27 = vpop.permute.xlu0 %923 }
0x1032   :  { %1329 = vmatmul.msk.bf16.vlgmr.msrb.gmra.mxu1 %vm190_vm6, %v924_v27 }
0x1073   :  { %v995_v49 = vpop.f32.mrf.mxu2  ;;  %v1008_v50 = vpop.f32.mrf.mxu3 }
0x1074   :  { %v1071_v46 = vadd.f32 %v995_v49, %v126_v42 }
0x1076   :  { %1476 = vtanh.f32 %v1071_v46  ;;  %v1335_v57 = vmul.f32 -1.442695, %v1071_v46 }
0x1078   :  { %1478 = vpow2.f32 %v1335_v57 }
0x107b   :  { %v997_v51 = vpop.f32.mrf.mxu2  ;;  %v1010_v53 = vpop.f32.mrf.mxu3 }
0x107c   :  { %v1477_v56 = vpop.eup %1476 }
0x107d   :  { %1094 = vrot.lane.b32.xlu2 %v1477_v56, %s1528_s1 }
0x107e   :  { %v1479_v52 = vpop.eup %1478 }
0x107f   :  { %v1075_v35 = vadd.f32 1.0, %v1479_v52 }
0x1081   :  { %v1087_v62 = vand.u32 2147483648, %v1075_v35  ;;  %vm1081_vm12 = vweird.f32 %v1075_v35  ;;  %v1085_v3 = vand.u32 2147483647, %v1075_v35 }
0x1083   :  { %v1088_v0 = vor.u32 1.1754944e-38, %v1087_v62  ;;  %vm1086_vm14 = vcmp.eq.f32.partialorder %v1085_v3, 8.507059e+37  ;;  %v1363_v62 = vld [vmem:[%s1896_s6 + $0x8] sm:$0xff]  ;;  %v1362_v3 = vld [vmem:[%s1896_s6] sm:$0xff] }
0x1084   :  { %1201 = vmatpush.bf16.msra.mxu2 %v1363_v62 }
0x1088   :  { %1202 = vmatpush.bf16.msra.mxu2 %v1362_v3 }
0x10af   :  { %v937_v24 = vpop.f32.mrf.mxu1 }
0x10b0   :  { %v1012_v58 = vadd.f32 %v1008_v50, %v937_v24 }
0x10b2   :  { %v1013_v55 = vadd.f32 %v1852_v59, %v1012_v58 }
0x10b4   :  { %1480 = vtanh.f32 %v1013_v55  ;;  %v1333_v43 = vmul.f32 -1.442695, %v1013_v55 }
0x10b5   :  { %1482 = vrcp.f32 %v1075_v35 }
0x10b6   :  { %1484 = vpow2.f32 %v1333_v43  ;;  %v1370_v43 = vld [vmem:[%s1897_s7] ss:$0 sm:$0xff] }
0x10b7   :  { %v939_v60 = vpop.f32.mrf.mxu1 }
0x10ba   :  { %v1481_v29 = vpop.eup %1480 }
0x10bb   :  { %1036 = vrot.lane.b32.xlu1 %v1481_v29, %s1528_s1  ;;  %v1483_v33 = vpop.eup %1482 }
0x10bc   :  { %v1077_v37 = vmul.f32 %v1483_v33, %v1075_v35  ;;  %vm1082_vm11 = vweird.f32 %v1483_v33  ;;  %v1485_v5 = vpop.eup %1484 }
0x10bd   :  { %vm1083_vm13 = vmor %vm1081_vm12, %vm1082_vm11  ;;  %v1017_v6 = vadd.f32 1.0, %v1485_v5 }
0x10be   :  { %v1078_v36 = vsub.f32 1.0, %v1077_v37 }
0x10bf   :  { %1486 = vrcp.f32 %v1017_v6  ;;  %v1029_v12 = vand.u32 2147483648, %v1017_v6  ;;  %vm1023_vm0 = vweird.f32 %v1017_v6  ;;  %v1027_v13 = vand.u32 2147483647, %v1017_v6 }
0x10c0   :  { %v1079_v54 = vmul.f32 %v1483_v33, %v1078_v36 }
0x10c1   :  { %v1030_v15 = vor.u32 1.1754944e-38, %v1029_v12  ;;  %vm1028_vm3 = vcmp.eq.f32.partialorder %v1027_v13, 8.507059e+37 }
0x10c2   :  { %v1080_v61 = vadd.f32 %v1483_v33, %v1079_v54 }
0x10c4   :  { %v1084_v63 = vsel %vm1083_vm13, %v1483_v33, %v1080_v61 }
0x10c5   :  { %v1089_v2 = vsel %vm1086_vm14, %v1088_v0, %v1084_v63  ;;  %v1487_v7 = vpop.eup %1486 }
0x10c6   :  { %v1019_v8 = vmul.f32 %v1487_v7, %v1017_v6  ;;  %vm1024_vm15 = vweird.f32 %v1487_v7  ;;  %v1092_v19 = vmul.f32 %v1089_v2, %v1832_v31 }
0x10c7   :  { %vm1025_vm2 = vmor %vm1023_vm0, %vm1024_vm15 }
0x10c8   :  { %v1020_v9 = vsub.f32 1.0, %v1019_v8 }
0x10ca   :  { %v1021_v10 = vmul.f32 %v1487_v7, %v1020_v9 }
0x10cc   :  { %v1022_v11 = vadd.f32 %v1487_v7, %v1021_v10  ;;  %v1371_v10 = vld [vmem:[%s1899_s9] ss:$0 sm:$0xff] }
0x10ce   :  { %v1026_v14 = vsel %vm1025_vm2, %v1487_v7, %v1022_v11 }
0x10cf   :  { %v1031_v17 = vsel %vm1028_vm3, %v1030_v15, %v1026_v14 }
0x10d0   :  { %v1034_v25 = vmul.f32 %v1031_v17, %v1837_v44 }
0x10d7   :  { %v1095_v1 = vpop.permute.xlu2 %1094 }
0x10d8   :  { %v1097_v4 = vmul.f32 %v1095_v1, %v1089_v2 }
0x10da   :  { %1099 = vrot.lane.b32.xlu1 %v1097_v4, %s1528_s1 }
0x112d   :  { %v1037_v16 = vpop.permute.xlu1 %1036 }
0x112e   :  { %v1039_v18 = vmul.f32 %v1037_v16, %v1031_v17 }
0x1130   :  { %1041 = vrot.lane.b32.xlu0 %v1039_v18, %s1528_s1 }
0x114c   :  { %v1100_v20 = vpop.permute.xlu1 %1099 }
0x114d   :  { %v1102_v21 = vadd.f32 %v1100_v20, %v1092_v19 }
0x114f   :  { %1488 = vtanh.f32 %v1102_v21 }
0x1155   :  { %v1489_v23 = vpop.eup %1488 }
0x1156   :  { %1105 = vrot.lane.b32.xlu0 %v1489_v23, %s1528_s1 }
0x11a2   :  { %v1042_v26 = vpop.permute.xlu0 %1041 }
0x11a3   :  { %v1044_v28 = vadd.f32 %v1042_v26, %v1034_v25 }
0x11a5   :  { %1490 = vtanh.f32 %v1044_v28 }
0x11ab   :  { %v1491_v32 = vpop.eup %1490 }
0x11ac   :  { %1047 = vrot.lane.b32.xlu2 %v1491_v32, %s1528_s1 }
0x11c8   :  { %v1106_v34 = vpop.permute.xlu0 %1105 }
0x11c9   :  { %v1108_v40 = vmul.f32 %v1106_v34, %v1089_v2  ;;  %v1364_v2 = vld [vmem:[%s1898_s8] sm:$0xff]  ;;  %s1530_s8 = smov [#allocation2]  }
0x11ca   :  { %1233 = vmatpush.bf16.msra.mxu3 %v1364_v2 }
0x11cb   :  { %v1109_v45 = vpack.c.bf16 %v1108_v40, %v1108_v40 }
0x11cd   :  { %1111 = vrot.lane.b32.xlu2 %v1109_v45, %s1529_s3 }
0x1206   :  { %v1048_v31 = vpop.permute.xlu2 %1047 }
0x1207   :  { %v1050_v38 = vmul.f32 %v1048_v31, %v1031_v17 }
0x1209   :  { %v1051_v22 = vpack.c.bf16 %v1050_v38, %v1050_v38 }
0x120b   :  { %1053 = vrot.lane.b32.xlu1 %v1051_v22, %s1529_s3 }
0x1227   :  { %v1112_v39 = vpop.permute.xlu2 %1111 }
0x1228   :  { %1336 = vmatmul.msk.bf16.vlgmr.msra.gmra.mxu1 %vm190_vm6, %v1112_v39 }
0x127d   :  { %v1054_v44 = vpop.permute.xlu1 %1053 }
0x127e   :  { %1334 = vmatmul.msk.bf16.vlgmr.msrb.gmra.mxu0 %vm190_vm6, %v1054_v44 }
0x12a5   :  { %v1125_v47 = vpop.f32.mrf.mxu1 }
0x12ad   :  { %v1127_v41 = vpop.f32.mrf.mxu1 }
0x12fb   :  { %v1067_v48 = vpop.f32.mrf.mxu0 }
0x12fc   :  { %v1129_v30 = vadd.f32 %v1125_v47, %v1067_v48 }
0x12fe   :  { %v1130_v27 = vadd.f32 %v1852_v59, %v1129_v30 }
0x1300   :  { %1492 = vtanh.f32 %v1130_v27  ;;  %v1337_v50 = vmul.f32 -1.442695, %v1130_v27 }
0x1302   :  { %1494 = vpow2.f32 %v1337_v50 }
0x1303   :  { %v1069_v42 = vpop.f32.mrf.mxu0 }
0x1306   :  { %v1493_v49 = vpop.eup %1492 }
0x1307   :  { %1153 = vrot.lane.b32.xlu0 %v1493_v49, %s1528_s1 }
0x1308   :  { %v1495_v46 = vpop.eup %1494 }
0x1309   :  { %v1134_v51 = vadd.f32 1.0, %v1495_v46 }
0x130b   :  { %1496 = vrcp.f32 %v1134_v51  ;;  %v1146_v55 = vand.u32 2147483648, %v1134_v51  ;;  %vm1140_vm5 = vweird.f32 %v1134_v51  ;;  %v1144_v52 = vand.u32 2147483647, %v1134_v51 }
0x130d   :  { %v1147_v35 = vor.u32 1.1754944e-38, %v1146_v55  ;;  %vm1145_vm8 = vcmp.eq.f32.partialorder %v1144_v52, 8.507059e+37 }
0x1311   :  { %v1497_v53 = vpop.eup %1496 }
0x1312   :  { %v1136_v56 = vmul.f32 %v1497_v53, %v1134_v51  ;;  %vm1141_vm4 = vweird.f32 %v1497_v53 }
0x1313   :  { %vm1142_vm7 = vmor %vm1140_vm5, %vm1141_vm4 }
0x1314   :  { %v1137_v57 = vsub.f32 1.0, %v1136_v56 }
0x1316   :  { %v1138_v24 = vmul.f32 %v1497_v53, %v1137_v57 }
0x1318   :  { %v1139_v58 = vadd.f32 %v1497_v53, %v1138_v24 }
0x131a   :  { %v1143_v59 = vsel %vm1142_vm7, %v1497_v53, %v1139_v58 }
0x131b   :  { %v1148_v29 = vsel %vm1145_vm8, %v1147_v35, %v1143_v59 }
0x131c   :  { %v1151_v37 = vmul.f32 %v1148_v29, %v1044_v28 }
0x1379   :  { %v1154_v60 = vpop.permute.xlu0 %1153 }
0x137a   :  { %v1156_v33 = vmul.f32 %v1154_v60, %v1148_v29 }
0x137c   :  { %1158 = vrot.lane.b32.xlu1 %v1156_v33, %s1528_s1 }
0x13ee   :  { %v1159_v36 = vpop.permute.xlu1 %1158 }
0x13ef   :  { %v1161_v54 = vadd.f32 %v1159_v36, %v1151_v37 }
0x13f1   :  { %1498 = vtanh.f32 %v1161_v54 }
0x13f7   :  { %v1499_v61 = vpop.eup %1498 }
0x13f8   :  { %1164 = vrot.lane.b32.xlu2 %v1499_v61, %s1528_s1 }
0x1452   :  { %v1165_v63 = vpop.permute.xlu2 %1164 }
0x1453   :  { %v1167_v0 = vmul.f32 %v1165_v63, %v1148_v29 }
0x1455   :  { %v1168_v1 = vpack.c.bf16 %v1167_v0, %v1167_v0 }
0x1457   :  { %1178 = vrot.lane.b32.xlu0 %v1168_v1, %s1529_s3  ;;  %s1245_s3 = sshll.u32 %s1530_s8, 4  ;;  %s1246_s3 = int_to_ptr.vmem [resolvable:$true] %s1245_s3 }
0x14c9   :  { %v1179_v4 = vpop.permute.xlu0 %1178 }
0x14ca   :  { %1346 = vmatmul.msk.bf16.vlgmr.msra.gmra.mxu2 %vm190_vm6, %v1179_v4 }
0x154d   :  { %v1204_v5 = vpop.f32.mrf.mxu2 }
0x154e   :  { %v1205_v6 = vadd.f32 %v1370_v43, %v1204_v5 }
0x1550   :  { %v1208_v7 = vmax.f32 %v1205_v6, 0.0 }
0x1552   :  { %v1209_v8 = vpack.c.bf16 %v1208_v7, %v1208_v7 }
0x1554   :  { %1351 = vmatmul.msk.bf16.vlgmr.msra.gmra.mxu3 %vm1222_vm9, %v1209_v8 }
0x1555   :  { %v1206_v9 = vpop.f32.mrf.mxu2 }
0x15d7   :  { %v1235_v11 = vpop.f32.mrf.mxu3 }
0x15d8   :  { %v1236_v12 = vadd.f32 %v1371_v10, %v1235_v11 }
0x15da   :  { %1239 = vst [vmem:[#allocation2] sm:$0xff] %v1236_v12 }
0x15db   :  { %1250 = dma.vmem_to_hbm [thread:$0]  %s1246_s3, 128, %s1248_s17, [#allocation3]  }
0x15df   :  { %v1237_v13 = vpop.f32.mrf.mxu3 }
0x15e0   :  { %1526 = dma.done.wait [#allocation3], 128  }
0x15e1   :  { %1527 = vsyncadd [#allocation3], 4294967168 }
0x15e2   :  { %1255 = vsyncpa [#allocation3], 1 }

</bundles_post_ra>
